<compile_context>
chip_gen: v7x
topology: tpu7x:2x2x1
jax: 0.10.0
libtpu: 0.0.40
codegen_flags: <defaults>
</compile_context>

<pallas_src>
import jax
import jax.numpy as jnp
from jax.experimental import pallas as pl
from jax.experimental.pallas import tpu as pltpu


def _leaky_relu(x, slope=0.2):
    return jnp.where(x > 0, x, slope * x)


def discriminator_kernel(x_ref, w1_ref, b1_ref, w2_ref, b2_ref, w3_ref, b3_ref,
                         out_ref):
    # x_ref: (TB, D) bf16 batch tile; weights resident in VMEM across the grid.
    x = x_ref[...]
    # Layer 1: bf16 MXU matmul, f32 accumulation + bias + LeakyReLU (VPU, f32).
    h1 = jnp.dot(x, w1_ref[...], preferred_element_type=jnp.float32) + b1_ref[...]
    h1 = _leaky_relu(h1)                                            # (TB, 512) f32
    # Layer 2: cast activation to bf16 for the MXU, accumulate in f32.
    h2 = jnp.dot(h1.astype(jnp.bfloat16), w2_ref[...],
                 preferred_element_type=jnp.float32) + b2_ref[...]
    h2 = _leaky_relu(h2)                                            # (TB, 256) f32
    # Layer 3: N=1 output -> VPU broadcast-mul + lane reduction instead of a
    # wasteful 1-column MXU pass. w3_ref is the weight row (1, 256) in f32.
    h3 = jnp.sum(h2 * w3_ref[...], axis=-1, keepdims=True) + b3_ref[...]
    out_ref[...] = jax.nn.sigmoid(h3)                               # (TB, 1)


def _round_up(x, m):
    return ((x + m - 1) // m) * m


def discriminator_forward(img, params):
    """img: (N, C, H, W) float32. Returns validity (N, 1) float32."""
    w1, b1, w2, b2, w3, b3 = params
    n = img.shape[0]
    x = img.reshape(n, -1).astype(jnp.float32)          # == torch .view(N, -1)
    d = x.shape[1]

    # Batch tile: 256 (MXU-aligned on v6e/v7x, 2x128 on v5e) for real batches,
    # otherwise pad tiny batches up to a 16-row tile (bf16 sublane packing).
    tb = 256 if n >= 256 else _round_up(n, 16)
    n_pad = _round_up(n, tb)
    if n_pad != n:
        x = jnp.pad(x, ((0, n_pad - n), (0, 0)))

    # bf16 inputs for the MXU; biases / last-layer weights stay f32 (VPU path).
    x_bf = x.astype(jnp.bfloat16)
    w1_bf = w1.astype(jnp.bfloat16)
    w2_bf = w2.astype(jnp.bfloat16)
    w3_row = w3.reshape(1, -1).astype(jnp.float32)      # (1, 256)
    b1f = b1.astype(jnp.float32)
    b2f = b2.astype(jnp.float32)
    b3f = b3.astype(jnp.float32)

    grid = (n_pad // tb,)
    h1_dim, h2_dim = w1.shape[1], w2.shape[1]

    cost = pl.CostEstimate(
        flops=2 * n * (d * h1_dim + h1_dim * h2_dim + h2_dim),
        transcendentals=n,  # sigmoid
        bytes_accessed=(n_pad * d * 2 + d * h1_dim * 2 + h1_dim * h2_dim * 2
                        + h2_dim * 4 + h1_dim * 4 + h2_dim * 4 + 4 + n_pad * 4),
    )

    out = pl.pallas_call(
        discriminator_kernel,
        out_shape=jax.ShapeDtypeStruct((n_pad, 1), jnp.float32),
        grid_spec=pltpu.PrefetchScalarGridSpec(
            num_scalar_prefetch=0,
            grid=grid,
            in_specs=[
                pl.BlockSpec((tb, d), lambda i: (i, 0)),        # x batch tile
                pl.BlockSpec((d, h1_dim), lambda i: (0, 0)),    # W1 (resident)
                pl.BlockSpec((1, h1_dim), lambda i: (0, 0)),    # b1
                pl.BlockSpec((h1_dim, h2_dim), lambda i: (0, 0)),  # W2 (resident)
                pl.BlockSpec((1, h2_dim), lambda i: (0, 0)),    # b2
                pl.BlockSpec((1, h2_dim), lambda i: (0, 0)),    # W3 row
                pl.BlockSpec((1, 1), lambda i: (0, 0)),         # b3
            ],
            out_specs=pl.BlockSpec((tb, 1), lambda i: (i, 0)),
        ),
        compiler_params=pltpu.CompilerParams(
            dimension_semantics=("parallel",),
            vmem_limit_bytes=32 * 1024 * 1024,
        ),
        cost_estimate=cost,
    )(x_bf, w1_bf, b1f, w2_bf, b2f, w3_row, b3f)

    return out[:n]


def init_params(key, in_features):
    """Deterministic init mimicking nn.Linear default (U[-1/sqrt(fan_in), +])."""
    dims = [(in_features, 512), (512, 256), (256, 1)]
    params = []
    for i, (fan_in, fan_out) in enumerate(dims):
        kw, kb = jax.random.split(jax.random.fold_in(key, i))
        bound = 1.0 / jnp.sqrt(jnp.float32(fan_in))
        w = jax.random.uniform(kw, (fan_in, fan_out), jnp.float32, -bound, bound)
        b = jax.random.uniform(kb, (1, fan_out), jnp.float32, -bound, bound)
        params += [w, b]
    return tuple(params)


if __name__ == "__main__":
    # Small shapes consistent with img_shape = (channels, img_size, img_size).
    B, C, H, W = 2, 4, 16, 16
    in_features = C * H * W  # 1024

    key = jax.random.PRNGKey(0)
    k_img, k_par = jax.random.split(key)
    img = jax.random.normal(k_img, (B, C, H, W), jnp.float32)
    params = init_params(k_par, in_features)

    out = discriminator_forward(img, params)
    out = jax.block_until_ready(out)
    assert out.shape == (B, 1)

    w1, b1, w2, b2, w3, b3 = params
    x = img.reshape(B, -1)

    # Reference 1: same bf16/f32 mixed-precision math as the kernel (tight tol).
    h1 = jnp.dot(x.astype(jnp.bfloat16), w1.astype(jnp.bfloat16),
                 preferred_element_type=jnp.float32) + b1
    h1 = jnp.where(h1 > 0, h1, 0.2 * h1)
    h2 = jnp.dot(h1.astype(jnp.bfloat16), w2.astype(jnp.bfloat16),
                 preferred_element_type=jnp.float32) + b2
    h2 = jnp.where(h2 > 0, h2, 0.2 * h2)
    ref_bf16 = jax.nn.sigmoid(
        jnp.sum(h2 * w3.reshape(1, -1), axis=-1, keepdims=True) + b3)
    assert jnp.allclose(out, ref_bf16, atol=5e-3, rtol=5e-3)

    # Reference 2: full f32 math (loose tolerance, guards overall semantics).
    r = x @ w1 + b1
    r = jnp.where(r > 0, r, 0.2 * r)
    r = r @ w2 + b2
    r = jnp.where(r > 0, r, 0.2 * r)
    ref_f32 = jax.nn.sigmoid(r @ w3 + b3)
    assert jnp.allclose(out, ref_f32, atol=3e-2, rtol=3e-2)

    print("KERNEL_OK")
</pallas_src>

<mosaic_0001>
module attributes {stable_mosaic.version = 11 : i64} {
  func.func @discriminator_kernel(%arg0: i32, %arg1: memref<16x1024xbf16, #tpu.memory_space<vmem>>, %arg2: memref<1024x512xbf16, #tpu.memory_space<vmem>>, %arg3: memref<1x512xf32, #tpu.memory_space<vmem>>, %arg4: memref<512x256xbf16, #tpu.memory_space<vmem>>, %arg5: memref<1x256xf32, #tpu.memory_space<vmem>>, %arg6: memref<1x256xf32, #tpu.memory_space<vmem>>, %arg7: memref<1x1xf32, #tpu.memory_space<vmem>>, %arg8: memref<16x1xf32, #tpu.memory_space<vmem>>) attributes {dimension_semantics = [#tpu.dimension_semantics<parallel>], iteration_bounds = array<i64: 1>, scalar_prefetch = 0 : i64, scratch_operands = 0 : i64, tpu.core_type = #tpu.core_type<tc>, window_params = [{transform_indices = @transform_0, window_bounds = array<i64: 16, 1024>}, {pipeline_mode = #tpu.pipeline_mode<synchronous>, transform_indices = @transform_1, window_bounds = array<i64: 1024, 512>}, {pipeline_mode = #tpu.pipeline_mode<synchronous>, transform_indices = @transform_2, window_bounds = array<i64: 1, 512>}, {pipeline_mode = #tpu.pipeline_mode<synchronous>, transform_indices = @transform_3, window_bounds = array<i64: 512, 256>}, {pipeline_mode = #tpu.pipeline_mode<synchronous>, transform_indices = @transform_4, window_bounds = array<i64: 1, 256>}, {pipeline_mode = #tpu.pipeline_mode<synchronous>, transform_indices = @transform_5, window_bounds = array<i64: 1, 256>}, {pipeline_mode = #tpu.pipeline_mode<synchronous>, transform_indices = @transform_6, window_bounds = array<i64: 1, 1>}, {transform_indices = @transform_7, window_bounds = array<i64: 16, 1>}]} {
    %c0 = arith.constant 0 : index
    %c0_0 = arith.constant 0 : index
    %0 = vector.load %arg1[%c0, %c0_0] : memref<16x1024xbf16, #tpu.memory_space<vmem>>, vector<16x1024xbf16>
    %c0_1 = arith.constant 0 : index
    %c0_2 = arith.constant 0 : index
    %1 = vector.load %arg2[%c0_1, %c0_2] : memref<1024x512xbf16, #tpu.memory_space<vmem>>, vector<1024x512xbf16>
    %cst = arith.constant dense<0.000000e+00> : vector<16x512xf32>
    %2 = tpu.matmul %0, %1, %cst {dimension_numbers = #tpu.dot_dimension_numbers<[1], [0], [0], [1], [0, 0, 1, 1], [], []>} : vector<16x1024xbf16>, vector<1024x512xbf16>, vector<16x512xf32> -> vector<16x512xf32>
    %c0_3 = arith.constant 0 : index
    %c0_4 = arith.constant 0 : index
    %3 = vector.load %arg3[%c0_3, %c0_4] : memref<1x512xf32, #tpu.memory_space<vmem>>, vector<1x512xf32>
    %4 = vector.broadcast %3 : vector<1x512xf32> to vector<16x512xf32>
    %5 = arith.addf %2, %4 : vector<16x512xf32>
    %cst_5 = arith.constant 0.000000e+00 : f32
    %6 = vector.broadcast %cst_5 : f32 to vector<16x512xf32>
    %7 = arith.cmpf ogt, %5, %6 : vector<16x512xf32>
    %cst_6 = arith.constant 2.000000e-01 : f32
    %8 = vector.broadcast %cst_6 : f32 to vector<16x512xf32>
    %9 = arith.mulf %8, %5 : vector<16x512xf32>
    %10 = arith.select %7, %5, %9 : vector<16x512xi1>, vector<16x512xf32>
    %11 = arith.truncf %10 : vector<16x512xf32> to vector<16x512xbf16>
    %c0_7 = arith.constant 0 : index
    %c0_8 = arith.constant 0 : index
    %12 = vector.load %arg4[%c0_7, %c0_8] : memref<512x256xbf16, #tpu.memory_space<vmem>>, vector<512x256xbf16>
    %cst_9 = arith.constant dense<0.000000e+00> : vector<16x256xf32>
    %13 = tpu.matmul %11, %12, %cst_9 {dimension_numbers = #tpu.dot_dimension_numbers<[1], [0], [0], [1], [0, 0, 1, 1], [], []>} : vector<16x512xbf16>, vector<512x256xbf16>, vector<16x256xf32> -> vector<16x256xf32>
    %c0_10 = arith.constant 0 : index
    %c0_11 = arith.constant 0 : index
    %14 = vector.load %arg5[%c0_10, %c0_11] : memref<1x256xf32, #tpu.memory_space<vmem>>, vector<1x256xf32>
    %15 = vector.broadcast %14 : vector<1x256xf32> to vector<16x256xf32>
    %16 = arith.addf %13, %15 : vector<16x256xf32>
    %cst_12 = arith.constant 0.000000e+00 : f32
    %17 = vector.broadcast %cst_12 : f32 to vector<16x256xf32>
    %18 = arith.cmpf ogt, %16, %17 : vector<16x256xf32>
    %cst_13 = arith.constant 2.000000e-01 : f32
    %19 = vector.broadcast %cst_13 : f32 to vector<16x256xf32>
    %20 = arith.mulf %19, %16 : vector<16x256xf32>
    %21 = arith.select %18, %16, %20 : vector<16x256xi1>, vector<16x256xf32>
    %c0_14 = arith.constant 0 : index
    %c0_15 = arith.constant 0 : index
    %22 = vector.load %arg6[%c0_14, %c0_15] : memref<1x256xf32, #tpu.memory_space<vmem>>, vector<1x256xf32>
    %23 = vector.broadcast %22 : vector<1x256xf32> to vector<16x256xf32>
    %24 = arith.mulf %21, %23 : vector<16x256xf32>
    %cst_16 = arith.constant dense<0.000000e+00> : vector<16xf32>
    %25 = vector.multi_reduction <add>, %24, %cst_16 [1] : vector<16x256xf32> to vector<16xf32>
    %26 = vector.shape_cast %25 : vector<16xf32> to vector<16x1xf32>
    %c0_17 = arith.constant 0 : index
    %c0_18 = arith.constant 0 : index
    %27 = vector.load %arg7[%c0_17, %c0_18] : memref<1x1xf32, #tpu.memory_space<vmem>>, vector<1x1xf32>
    %28 = vector.broadcast %27 : vector<1x1xf32> to vector<16x1xf32>
    %29 = arith.addf %26, %28 : vector<16x1xf32>
    %30 = arith.negf %29 : vector<16x1xf32>
    %31 = math.exp %30 : vector<16x1xf32>
    %cst_19 = arith.constant 1.000000e+00 : f32
    %32 = vector.broadcast %cst_19 : f32 to vector<16x1xf32>
    %33 = arith.addf %32, %31 : vector<16x1xf32>
    %34 = arith.divf %32, %33 : vector<16x1xf32>
    %c0_20 = arith.constant 0 : index
    %c0_21 = arith.constant 0 : index
    %35 = vector.load %arg8[%c0_20, %c0_21] : memref<16x1xf32, #tpu.memory_space<vmem>>, vector<16x1xf32>
    tpu.vector_store %arg8[%c0_20, %c0_21], %34 {strides = array<i32>} : memref<16x1xf32, #tpu.memory_space<vmem>>, vector<16x1xf32>,
    return
  }
  func.func @transform_0(%arg0: i32) -> (i32, i32) {
    %c0_i32 = arith.constant 0 : i32
    %c0_i32_0 = arith.constant 0 : i32
    return %arg0, %c0_i32 : i32, i32
  }
  func.func @transform_1(%arg0: i32) -> (i32, i32) {
    %c0_i32 = arith.constant 0 : i32
    %c0_i32_0 = arith.constant 0 : i32
    %c0_i32_1 = arith.constant 0 : i32
    return %c0_i32, %c0_i32_0 : i32, i32
  }
  func.func @transform_2(%arg0: i32) -> (i32, i32) {
    %c0_i32 = arith.constant 0 : i32
    %c0_i32_0 = arith.constant 0 : i32
    %c0_i32_1 = arith.constant 0 : i32
    return %c0_i32, %c0_i32_0 : i32, i32
  }
  func.func @transform_3(%arg0: i32) -> (i32, i32) {
    %c0_i32 = arith.constant 0 : i32
    %c0_i32_0 = arith.constant 0 : i32
    %c0_i32_1 = arith.constant 0 : i32
    return %c0_i32, %c0_i32_0 : i32, i32
  }
  func.func @transform_4(%arg0: i32) -> (i32, i32) {
    %c0_i32 = arith.constant 0 : i32
    %c0_i32_0 = arith.constant 0 : i32
    %c0_i32_1 = arith.constant 0 : i32
    return %c0_i32, %c0_i32_0 : i32, i32
  }
  func.func @transform_5(%arg0: i32) -> (i32, i32) {
    %c0_i32 = arith.constant 0 : i32
    %c0_i32_0 = arith.constant 0 : i32
    %c0_i32_1 = arith.constant 0 : i32
    return %c0_i32, %c0_i32_0 : i32, i32
  }
  func.func @transform_6(%arg0: i32) -> (i32, i32) {
    %c0_i32 = arith.constant 0 : i32
    %c0_i32_0 = arith.constant 0 : i32
    %c0_i32_1 = arith.constant 0 : i32
    return %c0_i32, %c0_i32_0 : i32, i32
  }
  func.func @transform_7(%arg0: i32) -> (i32, i32) {
    %c0_i32 = arith.constant 0 : i32
    %c0_i32_0 = arith.constant 0 : i32
    return %arg0, %c0_i32 : i32, i32
  }
}

</mosaic_0001>

<bundles_post_ra>
// kernel: tpu_custom_call.1
= control target key start
LH: loop header
LB: loop body
LE: loop exit
PB: predicated region body
PF: predicated region fallthrough
CT: control target
= control target key end

     0   :  { %s3709_s0 = inlined_call_operand.hbm [shape: bf16[16,1024], index: 0, kind: input, shape index: {}]   ;;  %s3710_s1 = inlined_call_operand.hbm [shape: bf16[1024,512], index: 1, kind: input, shape index: {}]   ;;  %s3711_s2 = inlined_call_operand.vmem [shape: f32[1,512], index: 2, kind: input, shape index: {}]   ;;  %s3712_s3 = inlined_call_operand.hbm [shape: bf16[512,256], index: 3, kind: input, shape index: {}]   ;;  %s3713_s4 = inlined_call_operand.vmem [shape: f32[1,256], index: 4, kind: input, shape index: {}]   ;;  %s3714_s5 = inlined_call_operand.vmem [shape: f32[1,256], index: 5, kind: input, shape index: {}]   ;;  %s3715_s6 = inlined_call_operand.<no memory space> [shape: f32[1,1], index: 6, kind: input, shape index: {}]   ;;  %s3716_s7 = inlined_call_operand.vmem [shape: f32[16,1], index: 7, kind: output, shape index: {}]  }
   0x1   :  { %v12_v0 = vstv %s3715_s6 }
   0x2   :  { %13 = vst [vmem:[#allocation2] sm:$0x1] %v12_v0 }
   0x3   :  { %14 = vsyncpa [#allocation4], 0 }
   0x4   :  { %15 = vsyncpa [#allocation6], 0  ;;  %s3531_s26 = smov [#allocation5]   ;;  %s3461_s30 = scalar_lea.hbm %s3710_s1, 32768 }
   0x5   :  { %s33_s27 = sshll.u32 %s3531_s26, 4  ;;  %p3462_p0 = scmp.ne.s32.totalorder %s3710_s1, %s3461_s30  ;;  %s34_s27 = int_to_ptr.vmem [resolvable:$true] %s33_s27 }
   0x6   :  { %p3465_p1 = scmp.lt.u32.totalorder %s3461_s30, %s3710_s1 }
   0x8   :  { %p3467_p2 = pnand %p3465_p1, %p3462_p0 }
   0xa   :  { %3470 = shalt.err (!%p3467_p2)
}
   0xb   :  { %s3471_s6 = scalar_lea.vmem %s34_s27, 32768  ;;  %p3476_p4 = scmp.lt.s32.totalorder %s34_s27, %s34_s27 }
   0xc   :  { %p3472_p3 = scmp.ne.s32.totalorder %s34_s27, %s3471_s6  ;;  %p3477_p5 = scmp.lt.s32.totalorder %s3471_s6, %s3471_s6 }
   0xe   :  { %p3478_p6 = por %p3477_p5, %p3476_p4 }
  0x10   :  { %p3479_p7 = pnand %p3478_p6, %p3472_p3 }
  0x12   :  { %3482 = shalt.err (!%p3479_p7)
}
  0x13   :  { %s3532_s12 = smov 256   ;;  %s3533_s13 = smov 16  }
  0x14   :  { %39 = dma.hbm_to_vmem [thread:$0]  %s3710_s1, 32768, %s34_s27, [#allocation6], %s3532_s12, %s3532_s12, %s3533_s13  }
  0x15   :  { %s3534_s16 = smov [#allocation3]   ;;  %s3483_s20 = scalar_lea.hbm %s3709_s0, 1024 }
  0x16   :  { %s21_s17 = sshll.u32 %s3534_s16, 4  ;;  %p3484_p8 = scmp.ne.s32.totalorder %s3709_s0, %s3483_s20  ;;  %s22_s17 = int_to_ptr.vmem [resolvable:$true] %s21_s17 }
  0x17   :  { %p3487_p9 = scmp.lt.u32.totalorder %s3483_s20, %s3709_s0 }
  0x19   :  { %p3489_p10 = pnand %p3487_p9, %p3484_p8 }
  0x1b   :  { %3492 = shalt.err (!%p3489_p10)
}
  0x1c   :  { %s3493_s25 = scalar_lea.vmem %s22_s17, 1024  ;;  %p3498_p12 = scmp.lt.s32.totalorder %s22_s17, %s22_s17 }
  0x1d   :  { %p3494_p11 = scmp.ne.s32.totalorder %s22_s17, %s3493_s25  ;;  %p3499_p13 = scmp.lt.s32.totalorder %s3493_s25, %s3493_s25 }
  0x1f   :  { %p3500_p0 = por %p3499_p13, %p3498_p12 }
  0x21   :  { %p3501_p1 = pnand %p3500_p0, %p3494_p11 }
  0x23   :  { %3504 = shalt.err (!%p3501_p1)
}
  0x24   :  { %s3535_s1 = smov 512   ;;  %s3536_s26 = smov 32  }
  0x25   :  { %27 = dma.hbm_to_vmem [thread:$0]  %s3709_s0, 1024, %s22_s17, [#allocation4], %s3535_s1, %s3535_s1, %s3536_s26  }
  0x26   :  { %s3537_s29 = smov [#allocation7]   ;;  %s3505_s10 = scalar_lea.hbm %s3712_s3, 8192 }
  0x27   :  { %s47_s30 = sshll.u32 %s3537_s29, 4  ;;  %p3506_p2 = scmp.ne.s32.totalorder %s3712_s3, %s3505_s10  ;;  %s48_s30 = int_to_ptr.vmem [resolvable:$true] %s47_s30 }
  0x28   :  { %p3509_p3 = scmp.lt.u32.totalorder %s3505_s10, %s3712_s3 }
  0x2a   :  { %p3511_p4 = pnand %p3509_p3, %p3506_p2 }
  0x2c   :  { %3514 = shalt.err (!%p3511_p4)
}
  0x2d   :  { %s3515_s14 = scalar_lea.vmem %s48_s30, 8192  ;;  %p3520_p6 = scmp.lt.s32.totalorder %s48_s30, %s48_s30 }
  0x2e   :  { %p3516_p5 = scmp.ne.s32.totalorder %s48_s30, %s3515_s14  ;;  %p3521_p7 = scmp.lt.s32.totalorder %s3515_s14, %s3515_s14 }
  0x30   :  { %p3522_p8 = por %p3521_p7, %p3520_p6 }
  0x32   :  { %p3523_p9 = pnand %p3522_p8, %p3516_p5 }
  0x34   :  { %3526 = shalt.err (!%p3523_p9)
}
  0x35   :  { %s3538_s0 = smov 128   ;;  %s3539_s15 = smov 8  }
  0x36   :  { %53 = dma.hbm_to_vmem [thread:$0]  %s3712_s3, 8192, %s48_s30, [#allocation6], %s3538_s0, %s3538_s0, %s3539_s15  }
  0x37   :  { %3527 = dma.done.wait [#allocation4], 1024  }
  0x38   :  { %3528 = vsyncadd [#allocation4], 4294966272 }
  0x39   :  { %3529 = dma.done.wait [#allocation6], 40960  }
  0x3a   :  { %3530 = vsyncadd [#allocation6], 4294926336  ;;  %v2973_v1 = vld [vmem:[#allocation5 + $0x4] ss:$16 sps:$4 sm:$0xff]   ;;  %v2977_v3 = vld [vmem:[#allocation5] ss:$16 sps:$4 sm:$0xff]  }
  0x3b   :  { %v2975_v2 = vld [vmem:[#allocation5 + $0x204] ss:$16 sps:$4 sm:$0xff]   ;;  %1675 = vmatprep.subr.bf16.mxu1 %v2973_v1  ;;  %v2978_v4 = vld [vmem:[#allocation5 + $0x200] ss:$16 sps:$4 sm:$0xff]   ;;  %v70_v51 = vld [vmem:[#allocation3 + $0x8] sm:$0xff]  ;;  %vm2584_vm12 = vcmask 7168  }
  0x3c   :  { %1718 = vmatprep.subr.bf16.mxu0 %v2975_v2  ;;  %v2979_v5 = vld [vmem:[#allocation5 + $0x24] ss:$16 sps:$4 sm:$0xff]   ;;  %1676 = vmatpush1.bf16.msra.mxu1 %v2977_v3  ;;  %v2983_v7 = vld [vmem:[#allocation5 + $0x20] ss:$16 sps:$4 sm:$0xff]   ;;  %v74_v52 = vld [vmem:[#allocation3 + $0x28] sm:$0xff] }
  0x3d   :  { %1719 = vmatpush1.bf16.msra.mxu0 %v2978_v4  ;;  %v2981_v6 = vld [vmem:[#allocation5 + $0x224] ss:$16 sps:$4 sm:$0xff]   ;;  %1677 = vmatprep.subr.bf16.mxu1 %v2979_v5  ;;  %v2984_v8 = vld [vmem:[#allocation5 + $0x220] ss:$16 sps:$4 sm:$0xff]   ;;  %v3619_v56 = vcombine.high %v70_v51, %v74_v52 }
  0x3e   :  { %1720 = vmatprep.subr.bf16.mxu0 %v2981_v6  ;;  %v2985_v9 = vld [vmem:[#allocation5 + $0x44] ss:$16 sps:$4 sm:$0xff]   ;;  %v2989_v11 = vld [vmem:[#allocation5 + $0x40] ss:$16 sps:$4 sm:$0xff]  }
  0x3f   :  { %v2987_v10 = vld [vmem:[#allocation5 + $0x244] ss:$16 sps:$4 sm:$0xff]   ;;  %v2990_v12 = vld [vmem:[#allocation5 + $0x240] ss:$16 sps:$4 sm:$0xff]   ;;  %1750 = vmatprep.mubr.bf16.mxu0 %v3619_v56 }
  0x40   :  { %1678 = vmatpush1.bf16.msra.mxu1 %v2983_v7  ;;  %v2991_v13 = vld [vmem:[#allocation5 + $0x64] ss:$16 sps:$4 sm:$0xff]   ;;  %v2995_v15 = vld [vmem:[#allocation5 + $0x60] ss:$16 sps:$4 sm:$0xff]  }
  0x41   :  { %1721 = vmatpush1.bf16.msra.mxu0 %v2984_v8  ;;  %1679 = vmatprep.subr.bf16.mxu1 %v2985_v9  ;;  %v2993_v14 = vld [vmem:[#allocation5 + $0x264] ss:$16 sps:$4 sm:$0xff]   ;;  %v2996_v16 = vld [vmem:[#allocation5 + $0x260] ss:$16 sps:$4 sm:$0xff]   ;;  %v3074_v8 = vld [vmem:[#allocation5 + $0xc] ss:$16 sps:$4 sm:$0xff]  }
  0x42   :  { %1722 = vmatprep.subr.bf16.mxu0 %v2987_v10  ;;  %v2997_v17 = vld [vmem:[#allocation5 + $0x84] ss:$16 sps:$4 sm:$0xff]   ;;  %v3001_v19 = vld [vmem:[#allocation5 + $0x80] ss:$16 sps:$4 sm:$0xff]   ;;  %v3624_v10 = vcombine.low %v70_v51, %v74_v52  ;;  %v3126_v51 = vld [vmem:[#allocation5 + $0x128] ss:$16 sps:$4 sm:$0xff]  }
  0x43   :  { %v2999_v18 = vld [vmem:[#allocation5 + $0x284] ss:$16 sps:$4 sm:$0xff]   ;;  %v3002_v20 = vld [vmem:[#allocation5 + $0x280] ss:$16 sps:$4 sm:$0xff]  }
  0x44   :  { %1680 = vmatpush1.bf16.msra.mxu1 %v2989_v11  ;;  %v3003_v21 = vld [vmem:[#allocation5 + $0xa4] ss:$16 sps:$4 sm:$0xff]   ;;  %v3007_v23 = vld [vmem:[#allocation5 + $0xa0] ss:$16 sps:$4 sm:$0xff]  }
  0x45   :  { %1723 = vmatpush1.bf16.msra.mxu0 %v2990_v12  ;;  %1681 = vmatprep.subr.bf16.mxu1 %v2991_v13  ;;  %v3005_v22 = vld [vmem:[#allocation5 + $0x2a4] ss:$16 sps:$4 sm:$0xff]   ;;  %v3008_v24 = vld [vmem:[#allocation5 + $0x2a0] ss:$16 sps:$4 sm:$0xff]   ;;  %v3072_v12 = vld [vmem:[#allocation5 + $0x8] ss:$16 sps:$4 sm:$0xff]  }
  0x46   :  { %1724 = vmatprep.subr.bf16.mxu0 %v2993_v14  ;;  %v3009_v25 = vld [vmem:[#allocation5 + $0xc4] ss:$16 sps:$4 sm:$0xff]   ;;  %v3013_v27 = vld [vmem:[#allocation5 + $0xc0] ss:$16 sps:$4 sm:$0xff]   ;;  %v3080_v14 = vld [vmem:[#allocation5 + $0x2c] ss:$16 sps:$4 sm:$0xff]  }
  0x47   :  { %v3011_v26 = vld [vmem:[#allocation5 + $0x2c4] ss:$16 sps:$4 sm:$0xff]   ;;  %v3014_v28 = vld [vmem:[#allocation5 + $0x2c0] ss:$16 sps:$4 sm:$0xff]  }
  0x48   :  { %1682 = vmatpush1.bf16.msra.mxu1 %v2995_v15  ;;  %v3015_v29 = vld [vmem:[#allocation5 + $0xe4] ss:$16 sps:$4 sm:$0xff]   ;;  %v3019_v31 = vld [vmem:[#allocation5 + $0xe0] ss:$16 sps:$4 sm:$0xff]  }
  0x49   :  { %1725 = vmatpush1.bf16.msra.mxu0 %v2996_v16  ;;  %1683 = vmatprep.subr.bf16.mxu1 %v2997_v17  ;;  %v3017_v30 = vld [vmem:[#allocation5 + $0x2e4] ss:$16 sps:$4 sm:$0xff]   ;;  %v3020_v32 = vld [vmem:[#allocation5 + $0x2e0] ss:$16 sps:$4 sm:$0xff]   ;;  %v3078_v16 = vld [vmem:[#allocation5 + $0x28] ss:$16 sps:$4 sm:$0xff]  }
  0x4a   :  { %1726 = vmatprep.subr.bf16.mxu0 %v2999_v18  ;;  %v3021_v33 = vld [vmem:[#allocation5 + $0x104] ss:$16 sps:$4 sm:$0xff]   ;;  %v3025_v35 = vld [vmem:[#allocation5 + $0x100] ss:$16 sps:$4 sm:$0xff]   ;;  %v3086_v18 = vld [vmem:[#allocation5 + $0x4c] ss:$16 sps:$4 sm:$0xff]  }
  0x4b   :  { %v3023_v34 = vld [vmem:[#allocation5 + $0x304] ss:$16 sps:$4 sm:$0xff]   ;;  %v3026_v36 = vld [vmem:[#allocation5 + $0x300] ss:$16 sps:$4 sm:$0xff]  }
  0x4c   :  { %1684 = vmatpush1.bf16.msra.mxu1 %v3001_v19  ;;  %v3027_v37 = vld [vmem:[#allocation5 + $0x124] ss:$16 sps:$4 sm:$0xff]   ;;  %v3031_v39 = vld [vmem:[#allocation5 + $0x120] ss:$16 sps:$4 sm:$0xff]  }
  0x4d   :  { %1727 = vmatpush1.bf16.msra.mxu0 %v3002_v20  ;;  %1685 = vmatprep.subr.bf16.mxu1 %v3003_v21  ;;  %v3029_v38 = vld [vmem:[#allocation5 + $0x324] ss:$16 sps:$4 sm:$0xff]   ;;  %v3032_v40 = vld [vmem:[#allocation5 + $0x320] ss:$16 sps:$4 sm:$0xff]   ;;  %v3084_v20 = vld [vmem:[#allocation5 + $0x48] ss:$16 sps:$4 sm:$0xff]  }
  0x4e   :  { %1728 = vmatprep.subr.bf16.mxu0 %v3005_v22  ;;  %v3033_v41 = vld [vmem:[#allocation5 + $0x144] ss:$16 sps:$4 sm:$0xff]   ;;  %v3037_v43 = vld [vmem:[#allocation5 + $0x140] ss:$16 sps:$4 sm:$0xff]   ;;  %v3092_v22 = vld [vmem:[#allocation5 + $0x6c] ss:$16 sps:$4 sm:$0xff]  }
  0x4f   :  { %v3035_v42 = vld [vmem:[#allocation5 + $0x344] ss:$16 sps:$4 sm:$0xff]   ;;  %v3038_v44 = vld [vmem:[#allocation5 + $0x340] ss:$16 sps:$4 sm:$0xff]  }
  0x50   :  { %1686 = vmatpush1.bf16.msra.mxu1 %v3007_v23  ;;  %v3039_v45 = vld [vmem:[#allocation5 + $0x164] ss:$16 sps:$4 sm:$0xff]   ;;  %v3043_v47 = vld [vmem:[#allocation5 + $0x160] ss:$16 sps:$4 sm:$0xff]  }
  0x51   :  { %1729 = vmatpush1.bf16.msra.mxu0 %v3008_v24  ;;  %1687 = vmatprep.subr.bf16.mxu1 %v3009_v25  ;;  %v3041_v46 = vld [vmem:[#allocation5 + $0x364] ss:$16 sps:$4 sm:$0xff]   ;;  %v3044_v48 = vld [vmem:[#allocation5 + $0x360] ss:$16 sps:$4 sm:$0xff]   ;;  %v3090_v24 = vld [vmem:[#allocation5 + $0x68] ss:$16 sps:$4 sm:$0xff]  }
  0x52   :  { %1730 = vmatprep.subr.bf16.mxu0 %v3011_v26  ;;  %v69_v49 = vld [vmem:[#allocation3] sm:$0xff]  ;;  %v3098_v26 = vld [vmem:[#allocation5 + $0x8c] ss:$16 sps:$4 sm:$0xff]  }
  0x53   :  { %v73_v50 = vld [vmem:[#allocation3 + $0x20] sm:$0xff] }
  0x54   :  { %1688 = vmatpush1.bf16.msra.mxu1 %v3013_v27  ;;  %v3045_v53 = vld [vmem:[#allocation5 + $0x184] ss:$16 sps:$4 sm:$0xff]   ;;  %v2594_v54 = vcombine.high %v69_v49, %v73_v50  ;;  %v3049_v57 = vld [vmem:[#allocation5 + $0x180] ss:$16 sps:$4 sm:$0xff]   ;;  %v3622_v9 = vcombine.low %v69_v49, %v73_v50  ;;  %v3128_v49 = vld [vmem:[#allocation5 + $0x12c] ss:$16 sps:$4 sm:$0xff]  }
  0x55   :  { %1731 = vmatpush1.bf16.msra.mxu0 %v3014_v28  ;;  %1689 = vmatprep.subr.bf16.mxu1 %v3015_v29  ;;  %v3047_v55 = vld [vmem:[#allocation5 + $0x384] ss:$16 sps:$4 sm:$0xff]   ;;  %v3050_v58 = vld [vmem:[#allocation5 + $0x380] ss:$16 sps:$4 sm:$0xff]   ;;  %v3096_v28 = vld [vmem:[#allocation5 + $0x88] ss:$16 sps:$4 sm:$0xff]  }
  0x56   :  { %1732 = vmatprep.subr.bf16.mxu0 %v3017_v30  ;;  %1707 = vmatprep.mubr.bf16.mxu1 %v2594_v54  ;;  %v3051_v59 = vld [vmem:[#allocation5 + $0x1a4] ss:$16 sps:$4 sm:$0xff]   ;;  %v3055_v61 = vld [vmem:[#allocation5 + $0x1a0] ss:$16 sps:$4 sm:$0xff]   ;;  %v3104_v30 = vld [vmem:[#allocation5 + $0xac] ss:$16 sps:$4 sm:$0xff]  }
  0x57   :  { %v3053_v60 = vld [vmem:[#allocation5 + $0x3a4] ss:$16 sps:$4 sm:$0xff]   ;;  %v3056_v62 = vld [vmem:[#allocation5 + $0x3a0] ss:$16 sps:$4 sm:$0xff]  }
  0x58   :  { %1690 = vmatpush1.bf16.msra.mxu1 %v3019_v31  ;;  %v3057_v63 = vld [vmem:[#allocation5 + $0x1c4] ss:$16 sps:$4 sm:$0xff]   ;;  %v3061_v1 = vld [vmem:[#allocation5 + $0x1c0] ss:$16 sps:$4 sm:$0xff]  }
  0x59   :  { %1733 = vmatpush1.bf16.msra.mxu0 %v3020_v32  ;;  %1691 = vmatprep.subr.bf16.mxu1 %v3021_v33  ;;  %v3059_v0 = vld [vmem:[#allocation5 + $0x3c4] ss:$16 sps:$4 sm:$0xff]   ;;  %v3062_v2 = vld [vmem:[#allocation5 + $0x3c0] ss:$16 sps:$4 sm:$0xff]   ;;  %v3102_v32 = vld [vmem:[#allocation5 + $0xa8] ss:$16 sps:$4 sm:$0xff]  }
  0x5a   :  { %1734 = vmatprep.subr.bf16.mxu0 %v3023_v34  ;;  %v3063_v3 = vld [vmem:[#allocation5 + $0x1e4] ss:$16 sps:$4 sm:$0xff]   ;;  %v3067_v5 = vld [vmem:[#allocation5 + $0x1e0] ss:$16 sps:$4 sm:$0xff]   ;;  %v3110_v34 = vld [vmem:[#allocation5 + $0xcc] ss:$16 sps:$4 sm:$0xff]  }
  0x5b   :  { %v3065_v4 = vld [vmem:[#allocation5 + $0x3e4] ss:$16 sps:$4 sm:$0xff]   ;;  %v3068_v6 = vld [vmem:[#allocation5 + $0x3e0] ss:$16 sps:$4 sm:$0xff]  }
  0x5c   :  { %1692 = vmatpush1.bf16.msra.mxu1 %v3025_v35  ;;  %v3071_v7 = vld [vmem:[#allocation5 + $0x404] ss:$16 sps:$4 sm:$0xff]   ;;  %v3069_v11 = vld [vmem:[#allocation5 + $0x400] ss:$16 sps:$4 sm:$0xff]  }
  0x5d   :  { %1735 = vmatpush1.bf16.msra.mxu0 %v3026_v36  ;;  %1693 = vmatprep.subr.bf16.mxu1 %v3027_v37  ;;  %v3077_v13 = vld [vmem:[#allocation5 + $0x424] ss:$16 sps:$4 sm:$0xff]   ;;  %v3075_v15 = vld [vmem:[#allocation5 + $0x420] ss:$16 sps:$4 sm:$0xff]  }
  0x5e   :  { %1736 = vmatprep.subr.bf16.mxu0 %v3029_v38  ;;  %v3083_v17 = vld [vmem:[#allocation5 + $0x444] ss:$16 sps:$4 sm:$0xff]   ;;  %v3081_v19 = vld [vmem:[#allocation5 + $0x440] ss:$16 sps:$4 sm:$0xff]   ;;  %v3108_v38 = vld [vmem:[#allocation5 + $0xc8] ss:$16 sps:$4 sm:$0xff]  }
  0x5f   :  { %v3089_v21 = vld [vmem:[#allocation5 + $0x464] ss:$16 sps:$4 sm:$0xff]   ;;  %v3087_v23 = vld [vmem:[#allocation5 + $0x460] ss:$16 sps:$4 sm:$0xff]  }
  0x60   :  { %1694 = vmatpush1.bf16.msra.mxu1 %v3031_v39  ;;  %v3095_v25 = vld [vmem:[#allocation5 + $0x484] ss:$16 sps:$4 sm:$0xff]   ;;  %v3093_v27 = vld [vmem:[#allocation5 + $0x480] ss:$16 sps:$4 sm:$0xff]  }
  0x61   :  { %1737 = vmatpush1.bf16.msra.mxu0 %v3032_v40  ;;  %1695 = vmatprep.subr.bf16.mxu1 %v3033_v41  ;;  %v3101_v29 = vld [vmem:[#allocation5 + $0x4a4] ss:$16 sps:$4 sm:$0xff]   ;;  %v3099_v31 = vld [vmem:[#allocation5 + $0x4a0] ss:$16 sps:$4 sm:$0xff]   ;;  %v3116_v41 = vld [vmem:[#allocation5 + $0xec] ss:$16 sps:$4 sm:$0xff]  }
  0x62   :  { %1738 = vmatprep.subr.bf16.mxu0 %v3035_v42  ;;  %v3107_v33 = vld [vmem:[#allocation5 + $0x4c4] ss:$16 sps:$4 sm:$0xff]   ;;  %v3105_v37 = vld [vmem:[#allocation5 + $0x4c0] ss:$16 sps:$4 sm:$0xff]  }
  0x63   :  { %v3628_v35 = vld [vmem:[#allocation3 + $0x10] sm:$0xff] }
  0x64   :  { %1696 = vmatpush1.bf16.msra.mxu1 %v3037_v43  ;;  %v3630_v36 = vld [vmem:[#allocation3 + $0x30] sm:$0xff]  ;;  %v3114_v43 = vld [vmem:[#allocation5 + $0xe8] ss:$16 sps:$4 sm:$0xff]  }
  0x65   :  { %1739 = vmatpush1.bf16.msra.mxu0 %v3038_v44  ;;  %1697 = vmatprep.subr.bf16.mxu1 %v3039_v45  ;;  %v3634_v39 = vcombine.high %v3628_v35, %v3630_v36  ;;  %v3113_v40 = vld [vmem:[#allocation5 + $0x4e4] ss:$16 sps:$4 sm:$0xff]   ;;  %v3111_v42 = vld [vmem:[#allocation5 + $0x4e0] ss:$16 sps:$4 sm:$0xff]   ;;  %v3122_v45 = vld [vmem:[#allocation5 + $0x10c] ss:$16 sps:$4 sm:$0xff]  }
  0x66   :  { %1740 = vmatprep.subr.bf16.mxu0 %v3041_v46  ;;  %v3119_v44 = vld [vmem:[#allocation5 + $0x504] ss:$16 sps:$4 sm:$0xff]   ;;  %v3117_v46 = vld [vmem:[#allocation5 + $0x500] ss:$16 sps:$4 sm:$0xff]  }
  0x67   :  { %v3123_v50 = vld [vmem:[#allocation5 + $0x520] ss:$16 sps:$4 sm:$0xff]   ;;  %v3131_v52 = vld [vmem:[#allocation5 + $0x544] ss:$16 sps:$4 sm:$0xff]  }
  0x68   :  { %1698 = vmatpush1.bf16.msra.mxu1 %v3043_v47  ;;  %v3120_v47 = vld [vmem:[#allocation5 + $0x108] ss:$16 sps:$4 sm:$0xff]  }
  0x69   :  { %1741 = vmatpush1.bf16.msra.mxu0 %v3044_v48  ;;  %1699 = vmatprep.subr.bf16.mxu1 %v3045_v53  ;;  %v3125_v48 = vld [vmem:[#allocation5 + $0x524] ss:$16 sps:$4 sm:$0xff]   ;;  %v3134_v53 = vld [vmem:[#allocation5 + $0x14c] ss:$16 sps:$4 sm:$0xff]  }
  0x6a   :  { %1742 = vmatprep.subr.bf16.mxu0 %v3047_v55  ;;  %v3132_v55 = vld [vmem:[#allocation5 + $0x148] ss:$16 sps:$4 sm:$0xff]  }
  0x6c   :  { %1700 = vmatpush1.bf16.msra.mxu1 %v3049_v57  ;;  %v3137_v57 = vld [vmem:[#allocation5 + $0x564] ss:$16 sps:$4 sm:$0xff]  }
  0x6d   :  { %1743 = vmatpush1.bf16.msra.mxu0 %v3050_v58  ;;  %1701 = vmatprep.subr.bf16.mxu1 %v3051_v59  ;;  %v3140_v58 = vld [vmem:[#allocation5 + $0x16c] ss:$16 sps:$4 sm:$0xff]   ;;  %v3135_v59 = vld [vmem:[#allocation5 + $0x560] ss:$16 sps:$4 sm:$0xff]  }
  0x6e   :  { %1744 = vmatprep.subr.bf16.mxu0 %v3053_v60  ;;  %v3138_v60 = vld [vmem:[#allocation5 + $0x168] ss:$16 sps:$4 sm:$0xff]  }
  0x70   :  { %1702 = vmatpush1.bf16.msra.mxu1 %v3055_v61  ;;  %v3143_v61 = vld [vmem:[#allocation5 + $0x584] ss:$16 sps:$4 sm:$0xff]  }
  0x71   :  { %1745 = vmatpush1.bf16.msra.mxu0 %v3056_v62  ;;  %1703 = vmatprep.subr.bf16.mxu1 %v3057_v63  ;;  %v3146_v62 = vld [vmem:[#allocation5 + $0x18c] ss:$16 sps:$4 sm:$0xff]   ;;  %v3141_v63 = vld [vmem:[#allocation5 + $0x580] ss:$16 sps:$4 sm:$0xff]  }
  0x72   :  { %1746 = vmatprep.subr.bf16.mxu0 %v3059_v0  ;;  %v3144_v0 = vld [vmem:[#allocation5 + $0x188] ss:$16 sps:$4 sm:$0xff]  }
  0x74   :  { %1704 = vmatpush1.bf16.msra.mxu1 %v3061_v1  ;;  %v3149_v1 = vld [vmem:[#allocation5 + $0x5a4] ss:$16 sps:$4 sm:$0xff]  }
  0x75   :  { %1747 = vmatpush1.bf16.msra.mxu0 %v3062_v2  ;;  %1705 = vmatprep.subr.bf16.mxu1 %v3063_v3  ;;  %v3152_v2 = vld [vmem:[#allocation5 + $0x1ac] ss:$16 sps:$4 sm:$0xff]   ;;  %v3147_v3 = vld [vmem:[#allocation5 + $0x5a0] ss:$16 sps:$4 sm:$0xff]  }
  0x76   :  { %1748 = vmatprep.subr.bf16.mxu0 %v3065_v4  ;;  %v3150_v4 = vld [vmem:[#allocation5 + $0x1a8] ss:$16 sps:$4 sm:$0xff]  }
  0x78   :  { %1706 = vmatpush1.bf16.msra.mxu1 %v3067_v5  ;;  %v3155_v5 = vld [vmem:[#allocation5 + $0x5c4] ss:$16 sps:$4 sm:$0xff]  }
  0x79   :  { %1749 = vmatpush1.bf16.msra.mxu0 %v3068_v6  ;;  %1847 = vmatprep.subr.bf16.mxu1 %v3074_v8  ;;  %v3158_v6 = vld [vmem:[#allocation5 + $0x1cc] ss:$16 sps:$4 sm:$0xff]   ;;  %v3156_v8 = vld [vmem:[#allocation5 + $0x1c8] ss:$16 sps:$4 sm:$0xff]  }
  0x7a   :  { %1761 = vmatprep.subr.bf16.mxu0 %v3071_v7  ;;  %v3153_v7 = vld [vmem:[#allocation5 + $0x5c0] ss:$16 sps:$4 sm:$0xff]  }
  0x7b   :  { %1708 = vmatmul.mubr.bf16.vlgmr.msra.gmra.mrb[0].mxu1 %v3622_v9 }
  0x7c   :  { %1751 = vmatmul.mubr.bf16.vlgmr.msra.gmra.mrb[0].mxu0 %v3624_v10  ;;  %1848 = vmatpush1.bf16.msra.mxu1 %v3072_v12  ;;  %v3164_v12 = vld [vmem:[#allocation5 + $0x1ec] ss:$16 sps:$4 sm:$0xff]  }
  0x7d   :  { %1762 = vmatpush1.bf16.msra.mxu0 %v3069_v11  ;;  %1849 = vmatprep.subr.bf16.mxu1 %v3080_v14  ;;  %v3161_v11 = vld [vmem:[#allocation5 + $0x5e4] ss:$16 sps:$4 sm:$0xff]   ;;  %v3162_v14 = vld [vmem:[#allocation5 + $0x1e8] ss:$16 sps:$4 sm:$0xff]  }
  0x7e   :  { %1763 = vmatprep.subr.bf16.mxu0 %v3077_v13  ;;  %1879 = vmatprep.mubr.bf16.mxu1 %v2594_v54  ;;  %v3129_v54 = vld [vmem:[#allocation5 + $0x540] ss:$16 sps:$4 sm:$0xff]  }
  0x7f   :  { %1793 = vmatprep.mubr.bf16.mxu0 %v3634_v39  ;;  %v3159_v13 = vld [vmem:[#allocation5 + $0x5e0] ss:$16 sps:$4 sm:$0xff]  }
  0x80   :  { %1850 = vmatpush1.bf16.msra.mxu1 %v3078_v16  ;;  %v3170_v16 = vld [vmem:[#allocation5 + $0x20c] ss:$16 sps:$4 sm:$0xff]  }
  0x81   :  { %1764 = vmatpush1.bf16.msra.mxu0 %v3075_v15  ;;  %1851 = vmatprep.subr.bf16.mxu1 %v3086_v18  ;;  %v3167_v15 = vld [vmem:[#allocation5 + $0x604] ss:$16 sps:$4 sm:$0xff]   ;;  %v3165_v18 = vld [vmem:[#allocation5 + $0x600] ss:$16 sps:$4 sm:$0xff]  }
  0x82   :  { %1765 = vmatprep.subr.bf16.mxu0 %v3083_v17  ;;  %v3639_v17 = vcombine.low %v3628_v35, %v3630_v36  ;;  %v3194_v35 = vld [vmem:[#allocation5 + $0x28c] ss:$16 sps:$4 sm:$0xff]   ;;  %v3189_v36 = vld [vmem:[#allocation5 + $0x680] ss:$16 sps:$4 sm:$0xff]  }
  0x84   :  { %1852 = vmatpush1.bf16.msra.mxu1 %v3084_v20  ;;  %v3173_v20 = vld [vmem:[#allocation5 + $0x624] ss:$16 sps:$4 sm:$0xff]  }
  0x85   :  { %1766 = vmatpush1.bf16.msra.mxu0 %v3081_v19  ;;  %1853 = vmatprep.subr.bf16.mxu1 %v3092_v22  ;;  %v3168_v19 = vld [vmem:[#allocation5 + $0x208] ss:$16 sps:$4 sm:$0xff]  }
  0x86   :  { %1767 = vmatprep.subr.bf16.mxu0 %v3089_v21  ;;  %v3176_v21 = vld [vmem:[#allocation5 + $0x22c] ss:$16 sps:$4 sm:$0xff]  }
  0x87   :  { %v3641_v22 = vld [vmem:[#allocation3 + $0x18] sm:$0xff] }
  0x88   :  { %1854 = vmatpush1.bf16.msra.mxu1 %v3090_v24  ;;  %v3171_v24 = vld [vmem:[#allocation5 + $0x620] ss:$16 sps:$4 sm:$0xff]  }
  0x89   :  { %1768 = vmatpush1.bf16.msra.mxu0 %v3087_v23  ;;  %1855 = vmatprep.subr.bf16.mxu1 %v3098_v26  ;;  %v3643_v23 = vld [vmem:[#allocation3 + $0x38] sm:$0xff] }
  0x8a   :  { %1769 = vmatprep.subr.bf16.mxu0 %v3095_v25  ;;  %v3174_v25 = vld [vmem:[#allocation5 + $0x228] ss:$16 sps:$4 sm:$0xff]   ;;  %v3649_v26 = vcombine.high %v3641_v22, %v3643_v23 }
  0x8c   :  { %1856 = vmatpush1.bf16.msra.mxu1 %v3096_v28  ;;  %v3182_v28 = vld [vmem:[#allocation5 + $0x24c] ss:$16 sps:$4 sm:$0xff]  }
  0x8d   :  { %1770 = vmatpush1.bf16.msra.mxu0 %v3093_v27  ;;  %1857 = vmatprep.subr.bf16.mxu1 %v3104_v30  ;;  %v3179_v27 = vld [vmem:[#allocation5 + $0x644] ss:$16 sps:$4 sm:$0xff]   ;;  %v3180_v30 = vld [vmem:[#allocation5 + $0x248] ss:$16 sps:$4 sm:$0xff]  }
  0x8e   :  { %1771 = vmatprep.subr.bf16.mxu0 %v3101_v29  ;;  %v3177_v29 = vld [vmem:[#allocation5 + $0x640] ss:$16 sps:$4 sm:$0xff]  }
  0x90   :  { %1858 = vmatpush1.bf16.msra.mxu1 %v3102_v32  ;;  %v3183_v32 = vld [vmem:[#allocation5 + $0x660] ss:$16 sps:$4 sm:$0xff]  }
  0x91   :  { %1772 = vmatpush1.bf16.msra.mxu0 %v3099_v31  ;;  %1859 = vmatprep.subr.bf16.mxu1 %v3110_v34  ;;  %v3188_v31 = vld [vmem:[#allocation5 + $0x26c] ss:$16 sps:$4 sm:$0xff]   ;;  %v3191_v34 = vld [vmem:[#allocation5 + $0x684] ss:$16 sps:$4 sm:$0xff]  }
  0x92   :  { %1773 = vmatprep.subr.bf16.mxu0 %v3107_v33  ;;  %v3186_v33 = vld [vmem:[#allocation5 + $0x268] ss:$16 sps:$4 sm:$0xff]  }
  0x94   :  { %1860 = vmatpush1.bf16.msra.mxu1 %v3108_v38  ;;  %v3200_v38 = vld [vmem:[#allocation5 + $0x2ac] ss:$16 sps:$4 sm:$0xff]  }
  0x95   :  { %1774 = vmatpush1.bf16.msra.mxu0 %v3105_v37  ;;  %1861 = vmatprep.subr.bf16.mxu1 %v3116_v41  ;;  %v3192_v37 = vld [vmem:[#allocation5 + $0x288] ss:$16 sps:$4 sm:$0xff]  }
  0x96   :  { %1775 = vmatprep.subr.bf16.mxu0 %v3113_v40  ;;  %v3195_v40 = vld [vmem:[#allocation5 + $0x6a0] ss:$16 sps:$4 sm:$0xff]   ;;  %v3198_v41 = vld [vmem:[#allocation5 + $0x2a8] ss:$16 sps:$4 sm:$0xff]  }
  0x98   :  { %1862 = vmatpush1.bf16.msra.mxu1 %v3114_v43  ;;  %v3206_v43 = vld [vmem:[#allocation5 + $0x2cc] ss:$16 sps:$4 sm:$0xff]  }
  0x99   :  { %1776 = vmatpush1.bf16.msra.mxu0 %v3111_v42  ;;  %1863 = vmatprep.subr.bf16.mxu1 %v3122_v45  ;;  %v3203_v42 = vld [vmem:[#allocation5 + $0x6c4] ss:$16 sps:$4 sm:$0xff]   ;;  %v3204_v45 = vld [vmem:[#allocation5 + $0x2c8] ss:$16 sps:$4 sm:$0xff]  }
  0x9a   :  { %1777 = vmatprep.subr.bf16.mxu0 %v3119_v44  ;;  %v3201_v44 = vld [vmem:[#allocation5 + $0x6c0] ss:$16 sps:$4 sm:$0xff]  }
  0x9c   :  { %1864 = vmatpush1.bf16.msra.mxu1 %v3120_v47  ;;  %v3212_v47 = vld [vmem:[#allocation5 + $0x2ec] ss:$16 sps:$4 sm:$0xff]  }
  0x9d   :  { %1778 = vmatpush1.bf16.msra.mxu0 %v3117_v46  ;;  %1865 = vmatprep.subr.bf16.mxu1 %v3128_v49  ;;  %v3209_v46 = vld [vmem:[#allocation5 + $0x6e4] ss:$16 sps:$4 sm:$0xff]   ;;  %v3210_v49 = vld [vmem:[#allocation5 + $0x2e8] ss:$16 sps:$4 sm:$0xff]  }
  0x9e   :  { %1779 = vmatprep.subr.bf16.mxu0 %v3125_v48  ;;  %v3207_v48 = vld [vmem:[#allocation5 + $0x6e0] ss:$16 sps:$4 sm:$0xff]  }
  0xa0   :  { %1866 = vmatpush1.bf16.msra.mxu1 %v3126_v51  ;;  %v3218_v51 = vld [vmem:[#allocation5 + $0x30c] ss:$16 sps:$4 sm:$0xff]  }
  0xa1   :  { %1780 = vmatpush1.bf16.msra.mxu0 %v3123_v50  ;;  %1867 = vmatprep.subr.bf16.mxu1 %v3134_v53  ;;  %v3215_v50 = vld [vmem:[#allocation5 + $0x704] ss:$16 sps:$4 sm:$0xff]   ;;  %v3216_v53 = vld [vmem:[#allocation5 + $0x308] ss:$16 sps:$4 sm:$0xff]  }
  0xa2   :  { %1781 = vmatprep.subr.bf16.mxu0 %v3131_v52  ;;  %v3213_v52 = vld [vmem:[#allocation5 + $0x700] ss:$16 sps:$4 sm:$0xff]  }
  0xa4   :  { %1868 = vmatpush1.bf16.msra.mxu1 %v3132_v55  ;;  %v3224_v55 = vld [vmem:[#allocation5 + $0x32c] ss:$16 sps:$4 sm:$0xff]  }
  0xa5   :  { %1782 = vmatpush1.bf16.msra.mxu0 %v3129_v54  ;;  %1869 = vmatprep.subr.bf16.mxu1 %v3140_v58  ;;  %v3221_v54 = vld [vmem:[#allocation5 + $0x724] ss:$16 sps:$4 sm:$0xff]   ;;  %v3222_v58 = vld [vmem:[#allocation5 + $0x328] ss:$16 sps:$4 sm:$0xff]  }
  0xa6   :  { %1783 = vmatprep.subr.bf16.mxu0 %v3137_v57  ;;  %v3219_v57 = vld [vmem:[#allocation5 + $0x720] ss:$16 sps:$4 sm:$0xff]  }
  0xa8   :  { %1870 = vmatpush1.bf16.msra.mxu1 %v3138_v60  ;;  %v3230_v60 = vld [vmem:[#allocation5 + $0x34c] ss:$16 sps:$4 sm:$0xff]  }
  0xa9   :  { %1784 = vmatpush1.bf16.msra.mxu0 %v3135_v59  ;;  %1871 = vmatprep.subr.bf16.mxu1 %v3146_v62  ;;  %v3227_v59 = vld [vmem:[#allocation5 + $0x744] ss:$16 sps:$4 sm:$0xff]   ;;  %v3228_v62 = vld [vmem:[#allocation5 + $0x348] ss:$16 sps:$4 sm:$0xff]  }
  0xaa   :  { %1785 = vmatprep.subr.bf16.mxu0 %v3143_v61  ;;  %v3225_v61 = vld [vmem:[#allocation5 + $0x740] ss:$16 sps:$4 sm:$0xff]  }
  0xac   :  { %1872 = vmatpush1.bf16.msra.mxu1 %v3144_v0  ;;  %v3236_v0 = vld [vmem:[#allocation5 + $0x36c] ss:$16 sps:$4 sm:$0xff]  }
  0xad   :  { %1786 = vmatpush1.bf16.msra.mxu0 %v3141_v63  ;;  %1873 = vmatprep.subr.bf16.mxu1 %v3152_v2  ;;  %v3233_v63 = vld [vmem:[#allocation5 + $0x764] ss:$16 sps:$4 sm:$0xff]   ;;  %v3234_v2 = vld [vmem:[#allocation5 + $0x368] ss:$16 sps:$4 sm:$0xff]  }
  0xae   :  { %1787 = vmatprep.subr.bf16.mxu0 %v3149_v1  ;;  %v3231_v1 = vld [vmem:[#allocation5 + $0x760] ss:$16 sps:$4 sm:$0xff]  }
  0xb0   :  { %1874 = vmatpush1.bf16.msra.mxu1 %v3150_v4  ;;  %v3242_v4 = vld [vmem:[#allocation5 + $0x38c] ss:$16 sps:$4 sm:$0xff]  }
  0xb1   :  { %1788 = vmatpush1.bf16.msra.mxu0 %v3147_v3  ;;  %1875 = vmatprep.subr.bf16.mxu1 %v3158_v6  ;;  %v3239_v3 = vld [vmem:[#allocation5 + $0x784] ss:$16 sps:$4 sm:$0xff]   ;;  %v3240_v6 = vld [vmem:[#allocation5 + $0x388] ss:$16 sps:$4 sm:$0xff]  }
  0xb2   :  { %1789 = vmatprep.subr.bf16.mxu0 %v3155_v5  ;;  %v3237_v5 = vld [vmem:[#allocation5 + $0x780] ss:$16 sps:$4 sm:$0xff]  }
  0xb4   :  { %1876 = vmatpush1.bf16.msra.mxu1 %v3156_v8  ;;  %v3248_v8 = vld [vmem:[#allocation5 + $0x3ac] ss:$16 sps:$4 sm:$0xff]  }
  0xb5   :  { %1790 = vmatpush1.bf16.msra.mxu0 %v3153_v7  ;;  %1877 = vmatprep.subr.bf16.mxu1 %v3164_v12  ;;  %v3245_v7 = vld [vmem:[#allocation5 + $0x7a4] ss:$16 sps:$4 sm:$0xff]   ;;  %v3246_v12 = vld [vmem:[#allocation5 + $0x3a8] ss:$16 sps:$4 sm:$0xff]  }
  0xb6   :  { %1791 = vmatprep.subr.bf16.mxu0 %v3161_v11  ;;  %v3243_v11 = vld [vmem:[#allocation5 + $0x7a0] ss:$16 sps:$4 sm:$0xff]  }
  0xb8   :  { %1878 = vmatpush1.bf16.msra.mxu1 %v3162_v14  ;;  %v3254_v14 = vld [vmem:[#allocation5 + $0x3cc] ss:$16 sps:$4 sm:$0xff]  }
  0xb9   :  { %1792 = vmatpush1.bf16.msra.mxu0 %v3159_v13  ;;  %1890 = vmatprep.subr.bf16.mxu1 %v3170_v16  ;;  %v3251_v13 = vld [vmem:[#allocation5 + $0x7c4] ss:$16 sps:$4 sm:$0xff]   ;;  %v3252_v16 = vld [vmem:[#allocation5 + $0x3c8] ss:$16 sps:$4 sm:$0xff]  }
  0xba   :  { %1804 = vmatprep.subr.bf16.mxu0 %v3167_v15  ;;  %v3249_v15 = vld [vmem:[#allocation5 + $0x7c0] ss:$16 sps:$4 sm:$0xff]  }
  0xbb   :  { %1880 = vmatmul.mubr.bf16.vlgmr.msra.gmra.mrb[4].mxu1 %v3622_v9  ;;  %v3185_v9 = vld [vmem:[#allocation5 + $0x664] ss:$16 sps:$4 sm:$0xff]  }
  0xbc   :  { %1794 = vmatmul.mubr.bf16.vlgmr.msra.gmra.mrb[0].mxu0 %v3639_v17  ;;  %1891 = vmatpush1.bf16.msra.mxu1 %v3168_v19  ;;  %v3260_v19 = vld [vmem:[#allocation5 + $0x3ec] ss:$16 sps:$4 sm:$0xff]  }
  0xbd   :  { %1805 = vmatpush1.bf16.msra.mxu0 %v3165_v18  ;;  %1892 = vmatprep.subr.bf16.mxu1 %v3176_v21  ;;  %v3257_v18 = vld [vmem:[#allocation5 + $0x7e4] ss:$16 sps:$4 sm:$0xff]   ;;  %v3258_v21 = vld [vmem:[#allocation5 + $0x3e8] ss:$16 sps:$4 sm:$0xff]  }
  0xbe   :  { %1806 = vmatprep.subr.bf16.mxu0 %v3173_v20  ;;  %1836 = vmatprep.mubr.bf16.mxu0 %v3649_v26  ;;  %v3255_v20 = vld [vmem:[#allocation5 + $0x7e0] ss:$16 sps:$4 sm:$0xff]  }
  0xbf   :  { %1922 = vmatprep.mubr.bf16.mxu1 %v3619_v56  ;;  %v3197_v56 = vld [vmem:[#allocation5 + $0x6a4] ss:$16 sps:$4 sm:$0xff]  }
  0xc0   :  { %1893 = vmatpush1.bf16.msra.mxu1 %v3174_v25  ;;  %v3261_v25 = vld [vmem:[#allocation5 + $0x408] ss:$16 sps:$4 sm:$0xff]  }
  0xc1   :  { %1807 = vmatpush1.bf16.msra.mxu0 %v3171_v24  ;;  %1894 = vmatprep.subr.bf16.mxu1 %v3182_v28  ;;  %v3263_v24 = vld [vmem:[#allocation5 + $0x40c] ss:$16 sps:$4 sm:$0xff]  }
  0xc2   :  { %1808 = vmatprep.subr.bf16.mxu0 %v3179_v27  ;;  %v3655_v27 = vcombine.low %v3641_v22, %v3643_v23  ;;  %v3266_v28 = vld [vmem:[#allocation5 + $0x42c] ss:$16 sps:$4 sm:$0xff]   ;;  %v3360_v22 = vld [vmem:[#allocation7 + $0x10] ss:$8 sps:$4 sm:$0xff]  }
  0xc3   :  { %v3365_v23 = vld [vmem:[#allocation7 + $0x24] ss:$8 sps:$4 sm:$0xff]  }
  0xc4   :  { %1895 = vmatpush1.bf16.msra.mxu1 %v3180_v30  ;;  %v3359_v30 = vld [vmem:[#allocation7 + $0x4] ss:$8 sps:$4 sm:$0xff]  }
  0xc5   :  { %1809 = vmatpush1.bf16.msra.mxu0 %v3177_v29  ;;  %1896 = vmatprep.subr.bf16.mxu1 %v3188_v31  ;;  %v3357_v29 = vld [vmem:[#allocation7] ss:$8 sps:$4 sm:$0xff]   ;;  %v3362_v31 = vld [vmem:[#allocation7 + $0x14] ss:$8 sps:$4 sm:$0xff]  }
  0xc6   :  { %1810 = vmatprep.subr.bf16.mxu0 %v3185_v9  ;;  %v3264_v9 = vld [vmem:[#allocation5 + $0x428] ss:$16 sps:$4 sm:$0xff]  }
  0xc8   :  { %1897 = vmatpush1.bf16.msra.mxu1 %v3186_v33  ;;  %v3267_v33 = vld [vmem:[#allocation5 + $0x448] ss:$16 sps:$4 sm:$0xff]  }
  0xc9   :  { %1811 = vmatpush1.bf16.msra.mxu0 %v3183_v32  ;;  %1898 = vmatprep.subr.bf16.mxu1 %v3194_v35  ;;  %v3269_v32 = vld [vmem:[#allocation5 + $0x44c] ss:$16 sps:$4 sm:$0xff]  }
  0xca   :  { %1812 = vmatprep.subr.bf16.mxu0 %v3191_v34  ;;  %v3272_v34 = vld [vmem:[#allocation5 + $0x46c] ss:$16 sps:$4 sm:$0xff]  }
  0xcb   :  { %v3368_v35 = vld [vmem:[#allocation7 + $0x34] ss:$8 sps:$4 sm:$0xff]  }
  0xcc   :  { %1899 = vmatpush1.bf16.msra.mxu1 %v3192_v37  ;;  %v3366_v37 = vld [vmem:[#allocation7 + $0x30] ss:$8 sps:$4 sm:$0xff]  }
  0xcd   :  { %1813 = vmatpush1.bf16.msra.mxu0 %v3189_v36  ;;  %1900 = vmatprep.subr.bf16.mxu1 %v3200_v38  ;;  %v3270_v36 = vld [vmem:[#allocation5 + $0x468] ss:$16 sps:$4 sm:$0xff]  }
  0xce   :  { %1814 = vmatprep.subr.bf16.mxu0 %v3197_v56  ;;  %v3371_v56 = vld [vmem:[#allocation7 + $0x44] ss:$8 sps:$4 sm:$0xff]   ;;  %v3273_v38 = vld [vmem:[#allocation5 + $0x488] ss:$16 sps:$4 sm:$0xff]  }
  0xd0   :  { %1901 = vmatpush1.bf16.msra.mxu1 %v3198_v41  ;;  %v3369_v41 = vld [vmem:[#allocation7 + $0x40] ss:$8 sps:$4 sm:$0xff]  }
  0xd1   :  { %1815 = vmatpush1.bf16.msra.mxu0 %v3195_v40  ;;  %1902 = vmatprep.subr.bf16.mxu1 %v3206_v43  ;;  %v3278_v40 = vld [vmem:[#allocation5 + $0x4ac] ss:$16 sps:$4 sm:$0xff]   ;;  %v3276_v43 = vld [vmem:[#allocation5 + $0x4a8] ss:$16 sps:$4 sm:$0xff]  }
  0xd2   :  { %1816 = vmatprep.subr.bf16.mxu0 %v3203_v42  ;;  %v3374_v42 = vld [vmem:[#allocation7 + $0x54] ss:$8 sps:$4 sm:$0xff]  }
  0xd4   :  { %1903 = vmatpush1.bf16.msra.mxu1 %v3204_v45  ;;  %v3372_v45 = vld [vmem:[#allocation7 + $0x50] ss:$8 sps:$4 sm:$0xff]  }
  0xd5   :  { %1817 = vmatpush1.bf16.msra.mxu0 %v3201_v44  ;;  %1904 = vmatprep.subr.bf16.mxu1 %v3212_v47  ;;  %v3281_v44 = vld [vmem:[#allocation5 + $0x4cc] ss:$16 sps:$4 sm:$0xff]   ;;  %v3279_v47 = vld [vmem:[#allocation5 + $0x4c8] ss:$16 sps:$4 sm:$0xff]  }
  0xd6   :  { %1818 = vmatprep.subr.bf16.mxu0 %v3209_v46  ;;  %v3377_v46 = vld [vmem:[#allocation7 + $0x64] ss:$8 sps:$4 sm:$0xff]  }
  0xd8   :  { %1905 = vmatpush1.bf16.msra.mxu1 %v3210_v49  ;;  %v3375_v49 = vld [vmem:[#allocation7 + $0x60] ss:$8 sps:$4 sm:$0xff]  }
  0xd9   :  { %1819 = vmatpush1.bf16.msra.mxu0 %v3207_v48  ;;  %1906 = vmatprep.subr.bf16.mxu1 %v3218_v51  ;;  %v3284_v48 = vld [vmem:[#allocation5 + $0x4ec] ss:$16 sps:$4 sm:$0xff]   ;;  %v3282_v51 = vld [vmem:[#allocation5 + $0x4e8] ss:$16 sps:$4 sm:$0xff]  }
  0xda   :  { %1820 = vmatprep.subr.bf16.mxu0 %v3215_v50  ;;  %v3380_v50 = vld [vmem:[#allocation7 + $0x74] ss:$8 sps:$4 sm:$0xff]  }
  0xdc   :  { %1907 = vmatpush1.bf16.msra.mxu1 %v3216_v53  ;;  %v3378_v53 = vld [vmem:[#allocation7 + $0x70] ss:$8 sps:$4 sm:$0xff]  }
  0xdd   :  { %1821 = vmatpush1.bf16.msra.mxu0 %v3213_v52  ;;  %1908 = vmatprep.subr.bf16.mxu1 %v3224_v55  ;;  %v3287_v52 = vld [vmem:[#allocation5 + $0x50c] ss:$16 sps:$4 sm:$0xff]   ;;  %v3285_v55 = vld [vmem:[#allocation5 + $0x508] ss:$16 sps:$4 sm:$0xff]  }
  0xde   :  { %1822 = vmatprep.subr.bf16.mxu0 %v3221_v54  ;;  %v3383_v54 = vld [vmem:[#allocation7 + $0x84] ss:$8 sps:$4 sm:$0xff]  }
  0xe0   :  { %1909 = vmatpush1.bf16.msra.mxu1 %v3222_v58  ;;  %v3381_v58 = vld [vmem:[#allocation7 + $0x80] ss:$8 sps:$4 sm:$0xff]  }
  0xe1   :  { %1823 = vmatpush1.bf16.msra.mxu0 %v3219_v57  ;;  %1910 = vmatprep.subr.bf16.mxu1 %v3230_v60  ;;  %v3290_v57 = vld [vmem:[#allocation5 + $0x52c] ss:$16 sps:$4 sm:$0xff]   ;;  %v3288_v60 = vld [vmem:[#allocation5 + $0x528] ss:$16 sps:$4 sm:$0xff]  }
  0xe2   :  { %1824 = vmatprep.subr.bf16.mxu0 %v3227_v59  ;;  %v3386_v59 = vld [vmem:[#allocation7 + $0x94] ss:$8 sps:$4 sm:$0xff]  }
  0xe4   :  { %1911 = vmatpush1.bf16.msra.mxu1 %v3228_v62  ;;  %v3384_v62 = vld [vmem:[#allocation7 + $0x90] ss:$8 sps:$4 sm:$0xff]  }
  0xe5   :  { %1825 = vmatpush1.bf16.msra.mxu0 %v3225_v61  ;;  %1912 = vmatprep.subr.bf16.mxu1 %v3236_v0  ;;  %v3293_v61 = vld [vmem:[#allocation5 + $0x54c] ss:$16 sps:$4 sm:$0xff]   ;;  %v3291_v0 = vld [vmem:[#allocation5 + $0x548] ss:$16 sps:$4 sm:$0xff]  }
  0xe6   :  { %1826 = vmatprep.subr.bf16.mxu0 %v3233_v63  ;;  %v3389_v63 = vld [vmem:[#allocation7 + $0xa4] ss:$8 sps:$4 sm:$0xff]  }
  0xe8   :  { %1913 = vmatpush1.bf16.msra.mxu1 %v3234_v2  ;;  %v3387_v2 = vld [vmem:[#allocation7 + $0xa0] ss:$8 sps:$4 sm:$0xff]  }
  0xe9   :  { %1827 = vmatpush1.bf16.msra.mxu0 %v3231_v1  ;;  %1914 = vmatprep.subr.bf16.mxu1 %v3242_v4  ;;  %v3296_v1 = vld [vmem:[#allocation5 + $0x56c] ss:$16 sps:$4 sm:$0xff]   ;;  %v3294_v4 = vld [vmem:[#allocation5 + $0x568] ss:$16 sps:$4 sm:$0xff]  }
  0xea   :  { %1828 = vmatprep.subr.bf16.mxu0 %v3239_v3  ;;  %v3392_v3 = vld [vmem:[#allocation7 + $0xb4] ss:$8 sps:$4 sm:$0xff]  }
  0xec   :  { %1915 = vmatpush1.bf16.msra.mxu1 %v3240_v6  ;;  %v3390_v6 = vld [vmem:[#allocation7 + $0xb0] ss:$8 sps:$4 sm:$0xff]  }
  0xed   :  { %1829 = vmatpush1.bf16.msra.mxu0 %v3237_v5  ;;  %1916 = vmatprep.subr.bf16.mxu1 %v3248_v8  ;;  %v3299_v5 = vld [vmem:[#allocation5 + $0x58c] ss:$16 sps:$4 sm:$0xff]   ;;  %v3297_v8 = vld [vmem:[#allocation5 + $0x588] ss:$16 sps:$4 sm:$0xff]  }
  0xee   :  { %1830 = vmatprep.subr.bf16.mxu0 %v3245_v7  ;;  %v3395_v7 = vld [vmem:[#allocation7 + $0xc4] ss:$8 sps:$4 sm:$0xff]  }
  0xf0   :  { %1917 = vmatpush1.bf16.msra.mxu1 %v3246_v12  ;;  %v3393_v12 = vld [vmem:[#allocation7 + $0xc0] ss:$8 sps:$4 sm:$0xff]  }
  0xf1   :  { %1831 = vmatpush1.bf16.msra.mxu0 %v3243_v11  ;;  %1918 = vmatprep.subr.bf16.mxu1 %v3254_v14  ;;  %v3302_v11 = vld [vmem:[#allocation5 + $0x5ac] ss:$16 sps:$4 sm:$0xff]  }
  0xf2   :  { %1832 = vmatprep.subr.bf16.mxu0 %v3251_v13  ;;  %v3300_v13 = vld [vmem:[#allocation5 + $0x5a8] ss:$16 sps:$4 sm:$0xff]   ;;  %v3305_v14 = vld [vmem:[#allocation5 + $0x5cc] ss:$16 sps:$4 sm:$0xff]  }
  0xf4   :  { %1919 = vmatpush1.bf16.msra.mxu1 %v3252_v16  ;;  %v3308_v16 = vld [vmem:[#allocation5 + $0x5ec] ss:$16 sps:$4 sm:$0xff]  }
  0xf5   :  { %1833 = vmatpush1.bf16.msra.mxu0 %v3249_v15  ;;  %1920 = vmatprep.subr.bf16.mxu1 %v3260_v19  ;;  %v3303_v15 = vld [vmem:[#allocation5 + $0x5c8] ss:$16 sps:$4 sm:$0xff]   ;;  %v3311_v19 = vld [vmem:[#allocation5 + $0x60c] ss:$16 sps:$4 sm:$0xff]  }
  0xf6   :  { %1834 = vmatprep.subr.bf16.mxu0 %v3257_v18  ;;  %v3306_v18 = vld [vmem:[#allocation5 + $0x5e8] ss:$16 sps:$4 sm:$0xff]  }
  0xf8   :  { %1921 = vmatpush1.bf16.msra.mxu1 %v3258_v21  ;;  %v3314_v21 = vld [vmem:[#allocation5 + $0x62c] ss:$16 sps:$4 sm:$0xff]  }
  0xf9   :  { %1835 = vmatpush1.bf16.msra.mxu0 %v3255_v20  ;;  %1933 = vmatprep.subr.bf16.mxu1 %v3263_v24  ;;  %v3309_v20 = vld [vmem:[#allocation5 + $0x608] ss:$16 sps:$4 sm:$0xff]  }
  0xfa   :  { %2443 = vmatprep.subr.bf16.mxu0 %v3359_v30  ;;  %v3312_v24 = vld [vmem:[#allocation5 + $0x628] ss:$16 sps:$4 sm:$0xff]  }
  0xfb   :  { %1923 = vmatmul.mubr.bf16.vlgmr.msra.gmra.mrb[4].mxu1 %v3624_v10  ;;  %v3363_v10 = vld [vmem:[#allocation7 + $0x20] ss:$8 sps:$4 sm:$0xff]  }
  0xfc   :  { %1837 = vmatmul.mubr.bf16.vlgmr.msra.gmra.mrb[0].mxu0 %v3655_v27  ;;  %1934 = vmatpush1.bf16.msra.mxu1 %v3261_v25  ;;  %v3317_v25 = vld [vmem:[#allocation5 + $0x64c] ss:$16 sps:$4 sm:$0xff]   ;;  %v3318_v30 = vld [vmem:[#allocation5 + $0x668] ss:$16 sps:$4 sm:$0xff]  }
  0xfd   :  { %1965 = vmatprep.mubr.bf16.mxu1 %v3634_v39  ;;  %1935 = vmatprep.subr.bf16.mxu1 %v3266_v28  ;;  %v3275_v39 = vld [vmem:[#allocation5 + $0x48c] ss:$16 sps:$4 sm:$0xff]   ;;  %v3315_v28 = vld [vmem:[#allocation5 + $0x648] ss:$16 sps:$4 sm:$0xff]  }
  0xfe   :  { %2444 = vmatpush1.bf16.msra.mxu0 %v3357_v29  ;;  %v3320_v29 = vld [vmem:[#allocation5 + $0x66c] ss:$16 sps:$4 sm:$0xff]  }
  0xff   :  { %2445 = vmatprep.subr.bf16.mxu0 %v3362_v31  ;;  %v3321_v31 = vld [vmem:[#allocation5 + $0x688] ss:$16 sps:$4 sm:$0xff]  }
 0x100   :  { %1936 = vmatpush1.bf16.msra.mxu1 %v3264_v9  ;;  %v3323_v9 = vld [vmem:[#allocation5 + $0x68c] ss:$16 sps:$4 sm:$0xff]  }
 0x101   :  { %1937 = vmatprep.subr.bf16.mxu1 %v3269_v32  ;;  %v3326_v32 = vld [vmem:[#allocation5 + $0x6ac] ss:$16 sps:$4 sm:$0xff]  }
 0x102   :  { %2446 = vmatpush1.bf16.msra.mxu0 %v3360_v22  ;;  %v3398_v22 = vld [vmem:[#allocation7 + $0xd4] ss:$8 sps:$4 sm:$0xff]  }
 0x103   :  { %2447 = vmatprep.subr.bf16.mxu0 %v3365_v23  ;;  %v3329_v23 = vld [vmem:[#allocation5 + $0x6cc] ss:$16 sps:$4 sm:$0xff]  }
 0x104   :  { %1938 = vmatpush1.bf16.msra.mxu1 %v3267_v33 }
 0x105   :  { %1939 = vmatprep.subr.bf16.mxu1 %v3272_v34 }
 0x106   :  { %2448 = vmatpush1.bf16.msra.mxu0 %v3363_v10 }
 0x107   :  { %2449 = vmatprep.subr.bf16.mxu0 %v3368_v35  ;;  %v3327_v35 = vld [vmem:[#allocation5 + $0x6c8] ss:$16 sps:$4 sm:$0xff]  }
 0x108   :  { %1940 = vmatpush1.bf16.msra.mxu1 %v3270_v36  ;;  %v3401_v36 = vld [vmem:[#allocation7 + $0xe4] ss:$8 sps:$4 sm:$0xff]  }
 0x109   :  { %1941 = vmatprep.subr.bf16.mxu1 %v3275_v39 }
 0x10a   :  { %2450 = vmatpush1.bf16.msra.mxu0 %v3366_v37  ;;  %v3332_v37 = vld [vmem:[#allocation5 + $0x6ec] ss:$16 sps:$4 sm:$0xff]  }
 0x10b   :  { %2451 = vmatprep.subr.bf16.mxu0 %v3371_v56  ;;  %v3399_v56 = vld [vmem:[#allocation7 + $0xe0] ss:$8 sps:$4 sm:$0xff]  }
 0x10c   :  { %1942 = vmatpush1.bf16.msra.mxu1 %v3273_v38  ;;  %v3330_v38 = vld [vmem:[#allocation5 + $0x6e8] ss:$16 sps:$4 sm:$0xff]  }
 0x10d   :  { %1943 = vmatprep.subr.bf16.mxu1 %v3278_v40  ;;  %v3404_v40 = vld [vmem:[#allocation7 + $0xf4] ss:$8 sps:$4 sm:$0xff]  }
 0x10e   :  { %2452 = vmatpush1.bf16.msra.mxu0 %v3369_v41  ;;  %v3335_v41 = vld [vmem:[#allocation5 + $0x70c] ss:$16 sps:$4 sm:$0xff]  }
 0x10f   :  { %2453 = vmatprep.subr.bf16.mxu0 %v3374_v42  ;;  %v3402_v42 = vld [vmem:[#allocation7 + $0xf0] ss:$8 sps:$4 sm:$0xff]  }
 0x110   :  { %1944 = vmatpush1.bf16.msra.mxu1 %v3276_v43  ;;  %v3333_v43 = vld [vmem:[#allocation5 + $0x708] ss:$16 sps:$4 sm:$0xff]  }
 0x111   :  { %1945 = vmatprep.subr.bf16.mxu1 %v3281_v44  ;;  %v3338_v44 = vld [vmem:[#allocation5 + $0x72c] ss:$16 sps:$4 sm:$0xff]  }
 0x112   :  { %2454 = vmatpush1.bf16.msra.mxu0 %v3372_v45  ;;  %v3407_v45 = vld [vmem:[#allocation7 + $0x104] ss:$8 sps:$4 sm:$0xff]  }
 0x113   :  { %2455 = vmatprep.subr.bf16.mxu0 %v3377_v46  ;;  %v3336_v46 = vld [vmem:[#allocation5 + $0x728] ss:$16 sps:$4 sm:$0xff]  }
 0x114   :  { %1946 = vmatpush1.bf16.msra.mxu1 %v3279_v47  ;;  %v3341_v47 = vld [vmem:[#allocation5 + $0x74c] ss:$16 sps:$4 sm:$0xff]  }
 0x115   :  { %1947 = vmatprep.subr.bf16.mxu1 %v3284_v48  ;;  %v3339_v48 = vld [vmem:[#allocation5 + $0x748] ss:$16 sps:$4 sm:$0xff]  }
 0x116   :  { %2456 = vmatpush1.bf16.msra.mxu0 %v3375_v49  ;;  %v3344_v49 = vld [vmem:[#allocation5 + $0x76c] ss:$16 sps:$4 sm:$0xff]  }
 0x117   :  { %2457 = vmatprep.subr.bf16.mxu0 %v3380_v50  ;;  %v3342_v50 = vld [vmem:[#allocation5 + $0x768] ss:$16 sps:$4 sm:$0xff]  }
 0x118   :  { %1948 = vmatpush1.bf16.msra.mxu1 %v3282_v51  ;;  %v3347_v51 = vld [vmem:[#allocation5 + $0x78c] ss:$16 sps:$4 sm:$0xff]  }
 0x119   :  { %1949 = vmatprep.subr.bf16.mxu1 %v3287_v52  ;;  %v3345_v52 = vld [vmem:[#allocation5 + $0x788] ss:$16 sps:$4 sm:$0xff]  }
 0x11a   :  { %2458 = vmatpush1.bf16.msra.mxu0 %v3378_v53  ;;  %v3350_v53 = vld [vmem:[#allocation5 + $0x7ac] ss:$16 sps:$4 sm:$0xff]  }
 0x11b   :  { %2459 = vmatprep.subr.bf16.mxu0 %v3383_v54  ;;  %v3348_v54 = vld [vmem:[#allocation5 + $0x7a8] ss:$16 sps:$4 sm:$0xff]  }
 0x11c   :  { %1950 = vmatpush1.bf16.msra.mxu1 %v3285_v55  ;;  %v3353_v55 = vld [vmem:[#allocation5 + $0x7cc] ss:$16 sps:$4 sm:$0xff]  }
 0x11d   :  { %1951 = vmatprep.subr.bf16.mxu1 %v3290_v57  ;;  %v3351_v57 = vld [vmem:[#allocation5 + $0x7c8] ss:$16 sps:$4 sm:$0xff]  }
 0x11e   :  { %2460 = vmatpush1.bf16.msra.mxu0 %v3381_v58  ;;  %v3356_v58 = vld [vmem:[#allocation5 + $0x7ec] ss:$16 sps:$4 sm:$0xff]  }
 0x11f   :  { %2461 = vmatprep.subr.bf16.mxu0 %v3386_v59  ;;  %v3354_v59 = vld [vmem:[#allocation5 + $0x7e8] ss:$16 sps:$4 sm:$0xff]  }
 0x120   :  { %1952 = vmatpush1.bf16.msra.mxu1 %v3288_v60  ;;  %v335_v60 = vlaneseq }
 0x121   :  { %1953 = vmatprep.subr.bf16.mxu1 %v3293_v61 }
 0x122   :  { %2462 = vmatpush1.bf16.msra.mxu0 %v3384_v62  ;;  %v3669_v61 = vshrl.u32 %v335_v60, 7 }
 0x123   :  { %2463 = vmatprep.subr.bf16.mxu0 %v3389_v63  ;;  %v3677_v63 = vld [vmem:[%s3711_s2] sm:$0xf] }
 0x124   :  { %1954 = vmatpush1.bf16.msra.mxu1 %v3291_v0  ;;  %v3672_v62 = vsub.s32 0, %v3669_v61  ;;  %v3680_v0 = vsub.s32 1, %v3669_v61 }
 0x125   :  { %1955 = vmatprep.subr.bf16.mxu1 %v3296_v1 }
 0x126   :  { %2464 = vmatpush1.bf16.msra.mxu0 %v3387_v2  ;;  %v338_v1 = vrot.slane %v3677_v63, %v3672_v62 }
 0x127   :  { %2465 = vmatprep.subr.bf16.mxu0 %v3392_v3 }
 0x128   :  { %1956 = vmatpush1.bf16.msra.mxu1 %v3294_v4 }
 0x129   :  { %1957 = vmatprep.subr.bf16.mxu1 %v3299_v5 }
 0x12a   :  { %2466 = vmatpush1.bf16.msra.mxu0 %v3390_v6 }
 0x12b   :  { %2467 = vmatprep.subr.bf16.mxu0 %v3395_v7 }
 0x12c   :  { %1958 = vmatpush1.bf16.msra.mxu1 %v3297_v8 }
 0x12d   :  { %1959 = vmatprep.subr.bf16.mxu1 %v3302_v11 }
 0x12e   :  { %2468 = vmatpush1.bf16.msra.mxu0 %v3393_v12 }
 0x12f   :  { %2469 = vmatprep.subr.bf16.mxu0 %v3398_v22  ;;  %v3411_v22 = vld [vmem:[#allocation7 + $0x120] ss:$8 sps:$4 sm:$0xff]  }
 0x130   :  { %1960 = vmatpush1.bf16.msra.mxu1 %v3300_v13 }
 0x131   :  { %1961 = vmatprep.subr.bf16.mxu1 %v3305_v14 }
 0x134   :  { %1962 = vmatpush1.bf16.msra.mxu1 %v3303_v15 }
 0x135   :  { %1963 = vmatprep.subr.bf16.mxu1 %v3308_v16 }
 0x138   :  { %1964 = vmatpush1.bf16.msra.mxu1 %v3306_v18 }
 0x139   :  { %1976 = vmatprep.subr.bf16.mxu1 %v3311_v19 }
 0x13b   :  { %1966 = vmatmul.mubr.bf16.vlgmr.msra.gmra.mrb[4].mxu1 %v3639_v17  ;;  %v3324_v17 = vld [vmem:[#allocation5 + $0x6a8] ss:$16 sps:$4 sm:$0xff]  }
 0x13c   :  { %1977 = vmatpush1.bf16.msra.mxu1 %v3309_v20  ;;  %2008 = vmatprep.mubr.bf16.mxu1 %v3649_v26  ;;  %v3396_v26 = vld [vmem:[#allocation7 + $0xd0] ss:$8 sps:$4 sm:$0xff]  }
 0x13d   :  { %1978 = vmatprep.subr.bf16.mxu1 %v3314_v21  ;;  %2470 = vmatpush1.bf16.msra.mxu0 %v3396_v26  ;;  %v3414_v26 = vld [vmem:[#allocation7 + $0x130] ss:$8 sps:$4 sm:$0xff]  }
 0x13e   :  { %2471 = vmatprep.subr.bf16.mxu0 %v3401_v36  ;;  %v3425_v36 = vld [vmem:[#allocation7 + $0x164] ss:$8 sps:$4 sm:$0xff]  }
 0x140   :  { %1979 = vmatpush1.bf16.msra.mxu1 %v3312_v24 }
 0x141   :  { %1980 = vmatprep.subr.bf16.mxu1 %v3317_v25  ;;  %2472 = vmatpush1.bf16.msra.mxu0 %v3399_v56  ;;  %v3426_v56 = vld [vmem:[#allocation7 + $0x170] ss:$8 sps:$4 sm:$0xff]  }
 0x142   :  { %2473 = vmatprep.subr.bf16.mxu0 %v3404_v40  ;;  %v3429_v40 = vld [vmem:[#allocation7 + $0x180] ss:$8 sps:$4 sm:$0xff]  }
 0x144   :  { %1981 = vmatpush1.bf16.msra.mxu1 %v3315_v28 }
 0x145   :  { %1982 = vmatprep.subr.bf16.mxu1 %v3320_v29  ;;  %2474 = vmatpush1.bf16.msra.mxu0 %v3402_v42  ;;  %v3432_v42 = vld [vmem:[#allocation7 + $0x190] ss:$8 sps:$4 sm:$0xff]  }
 0x146   :  { %2486 = vmatprep.subr.bf16.mxu0 %v3407_v45  ;;  %v3440_v45 = vld [vmem:[#allocation7 + $0x1b4] ss:$8 sps:$4 sm:$0xff]  }
 0x148   :  { %1983 = vmatpush1.bf16.msra.mxu1 %v3318_v30 }
 0x149   :  { %1984 = vmatprep.subr.bf16.mxu1 %v3323_v9  ;;  %v3405_v9 = vld [vmem:[#allocation7 + $0x100] ss:$8 sps:$4 sm:$0xff]  }
 0x14c   :  { %1985 = vmatpush1.bf16.msra.mxu1 %v3321_v31  ;;  %v3410_v31 = vld [vmem:[#allocation7 + $0x114] ss:$8 sps:$4 sm:$0xff]  }
 0x14d   :  { %1986 = vmatprep.subr.bf16.mxu1 %v3326_v32  ;;  %v3408_v32 = vld [vmem:[#allocation7 + $0x110] ss:$8 sps:$4 sm:$0xff]  }
 0x14e   :  { %v3662_v33 = vpop.f32.mrb[0].mxu1 }
 0x14f   :  { %v3664_v34 = vpop.f32.mrb[1].mxu1  ;;  %v1710_v2 = vadd.f32 %v3662_v33, %v338_v1  ;;  %v3419_v33 = vld [vmem:[#allocation7 + $0x144] ss:$8 sps:$4 sm:$0xff]  }
 0x150   :  { %v3666_v10 = vpop.f32.mrb[2].mxu1  ;;  %1987 = vmatpush1.bf16.msra.mxu1 %v3324_v17  ;;  %v3413_v17 = vld [vmem:[#allocation7 + $0x124] ss:$8 sps:$4 sm:$0xff]  }
 0x151   :  { %v1715_v39 = vpop.f32.mrb[3].mxu1  ;;  %1988 = vmatprep.subr.bf16.mxu1 %v3329_v23  ;;  %v1714_v5 = vadd.f32 %v3666_v10, %v338_v1  ;;  %v3416_v23 = vld [vmem:[#allocation7 + $0x134] ss:$8 sps:$4 sm:$0xff]  }
 0x152   :  { %v3422_v10 = vld [vmem:[#allocation7 + $0x154] ss:$8 sps:$4 sm:$0xff]  }
 0x154   :  { %1989 = vmatpush1.bf16.msra.mxu1 %v3327_v35  ;;  %v3420_v35 = vld [vmem:[#allocation7 + $0x150] ss:$8 sps:$4 sm:$0xff]  }
 0x155   :  { %1990 = vmatprep.subr.bf16.mxu1 %v3332_v37  ;;  %v3428_v37 = vld [vmem:[#allocation7 + $0x174] ss:$8 sps:$4 sm:$0xff]  }
 0x158   :  { %1991 = vmatpush1.bf16.msra.mxu1 %v3330_v38  ;;  %v3431_v38 = vld [vmem:[#allocation7 + $0x184] ss:$8 sps:$4 sm:$0xff]  }
 0x159   :  { %1992 = vmatprep.subr.bf16.mxu1 %v3335_v41  ;;  %v3434_v41 = vld [vmem:[#allocation7 + $0x194] ss:$8 sps:$4 sm:$0xff]  }
 0x15c   :  { %1993 = vmatpush1.bf16.msra.mxu1 %v3333_v43  ;;  %v3437_v43 = vld [vmem:[#allocation7 + $0x1a4] ss:$8 sps:$4 sm:$0xff]  }
 0x15d   :  { %1994 = vmatprep.subr.bf16.mxu1 %v3338_v44  ;;  %v3435_v44 = vld [vmem:[#allocation7 + $0x1a0] ss:$8 sps:$4 sm:$0xff]  }
 0x160   :  { %1995 = vmatpush1.bf16.msra.mxu1 %v3336_v46  ;;  %v3438_v46 = vld [vmem:[#allocation7 + $0x1b0] ss:$8 sps:$4 sm:$0xff]  }
 0x161   :  { %1996 = vmatprep.subr.bf16.mxu1 %v3341_v47  ;;  %v3443_v47 = vld [vmem:[#allocation7 + $0x1c4] ss:$8 sps:$4 sm:$0xff]  }
 0x164   :  { %1997 = vmatpush1.bf16.msra.mxu1 %v3339_v48  ;;  %v3441_v48 = vld [vmem:[#allocation7 + $0x1c0] ss:$8 sps:$4 sm:$0xff]  }
 0x165   :  { %1998 = vmatprep.subr.bf16.mxu1 %v3344_v49  ;;  %v3446_v49 = vld [vmem:[#allocation7 + $0x1d4] ss:$8 sps:$4 sm:$0xff]  }
 0x168   :  { %1999 = vmatpush1.bf16.msra.mxu1 %v3342_v50  ;;  %v3444_v50 = vld [vmem:[#allocation7 + $0x1d0] ss:$8 sps:$4 sm:$0xff]  }
 0x169   :  { %2000 = vmatprep.subr.bf16.mxu1 %v3347_v51  ;;  %v3449_v51 = vld [vmem:[#allocation7 + $0x1e4] ss:$8 sps:$4 sm:$0xff]  }
 0x16c   :  { %2001 = vmatpush1.bf16.msra.mxu1 %v3345_v52  ;;  %v3447_v52 = vld [vmem:[#allocation7 + $0x1e0] ss:$8 sps:$4 sm:$0xff]  }
 0x16d   :  { %2002 = vmatprep.subr.bf16.mxu1 %v3350_v53  ;;  %v3452_v53 = vld [vmem:[#allocation7 + $0x1f4] ss:$8 sps:$4 sm:$0xff]  }
 0x170   :  { %2003 = vmatpush1.bf16.msra.mxu1 %v3348_v54  ;;  %v3450_v54 = vld [vmem:[#allocation7 + $0x1f0] ss:$8 sps:$4 sm:$0xff]  }
 0x171   :  { %2004 = vmatprep.subr.bf16.mxu1 %v3353_v55  ;;  %v345_v55 = vsub.s32 2, %v3669_v61 }
 0x174   :  { %2005 = vmatpush1.bf16.msra.mxu1 %v3351_v57  ;;  %v349_v57 = vsub.s32 3, %v3669_v61 }
 0x175   :  { %2006 = vmatprep.subr.bf16.mxu1 %v3356_v58  ;;  %v346_v58 = vrot.slane %v3677_v63, %v345_v55 }
 0x178   :  { %2007 = vmatpush1.bf16.msra.mxu1 %v3354_v59  ;;  %v350_v59 = vrot.slane %v3677_v63, %v349_v57 }
 0x17b   :  { %2009 = vmatmul.mubr.bf16.vlgmr.msra.gmra.mrb[4].mxu1 %v3655_v27  ;;  %v342_v27 = vrot.slane %v3677_v63, %v3680_v0 }
 0x17d   :  { %v1712_v3 = vadd.f32 %v3664_v34, %v342_v27  ;;  %v1716_v8 = vadd.f32 %v1715_v39, %v342_v27  ;;  %v3417_v34 = vld [vmem:[#allocation7 + $0x140] ss:$8 sps:$4 sm:$0xff]  }
 0x17e   :  { %v3423_v39 = vld [vmem:[#allocation7 + $0x160] ss:$8 sps:$4 sm:$0xff]  }
 0x1cf   :  { %v1838_v4 = vpop.f32.mrb[0].mxu0 }
 0x1d0   :  { %v2925_v6 = vadd.f32 %v1838_v4, %v1710_v2  ;;  %v1840_v7 = vpop.f32.mrb[1].mxu0 }
 0x1d1   :  { %v2927_v11 = vadd.f32 %v1840_v7, %v1712_v3  ;;  %v1842_v12 = vpop.f32.mrb[2].mxu0 }
 0x1d2   :  { %v2027_v13 = vmul.f32 0.2, %v2925_v6  ;;  %v2929_v14 = vadd.f32 %v1842_v12, %v1714_v5  ;;  %v1844_v15 = vpop.f32.mrb[3].mxu0  ;;  %vm2019_vm0 = vcmp.gt.f32.partialorder %v2925_v6, 0.0 }
 0x1d3   :  { %v2028_v16 = vmul.f32 0.2, %v2927_v11  ;;  %v2931_v18 = vadd.f32 %v1844_v15, %v1716_v8  ;;  %vm2020_vm1 = vcmp.gt.f32.partialorder %v2927_v11, 0.0 }
 0x1d4   :  { %vm2023_vm2 = vcmp.gt.f32.partialorder %v2929_v14, 0.0  ;;  %v2031_v19 = vmul.f32 0.2, %v2929_v14  ;;  %v2035_v21 = vsel %vm2019_vm0, %v2925_v6, %v2027_v13 }
 0x1d5   :  { %vm2024_vm3 = vcmp.gt.f32.partialorder %v2931_v18, 0.0  ;;  %v2032_v20 = vmul.f32 0.2, %v2931_v18  ;;  %v2036_v28 = vsel %vm2020_vm1, %v2927_v11, %v2028_v16 }
 0x1d6   :  { %v2039_v24 = vsel %vm2023_vm2, %v2929_v14, %v2031_v19 }
 0x1d7   :  { %v2043_v25 = vpack.c.bf16 %v2039_v24, %v2035_v21  ;;  %v2040_v29 = vsel %vm2024_vm3, %v2931_v18, %v2032_v20  ;;  %v2111_v18 = vld [vmem:[%s3713_s4] sm:$0x3] }
 0x1d8   :  { %v2044_v30 = vpack.c.bf16 %v2040_v29, %v2036_v28  ;;  %v2116_v19 = vrot.slane %v2111_v18, %v3672_v62  ;;  %v2120_v20 = vrot.slane %v2111_v18, %v3680_v0  ;;  %v2541_v21 = vld [vmem:[%s3714_s5] sm:$0x3] }
 0x1da   :  { %2475 = vmatprep.mubr.bf16.mxu0 %v2044_v30 }
 0x1db   :  { %2476 = vmatmul.mubr.bf16.vlgmr.msra.gmra.mrb[4].mxu0 %v2043_v25 }
 0x1dc   :  { %2487 = vmatpush1.bf16.msra.mxu0 %v3405_v9  ;;  %v2546_v9 = vrot.slane %v2541_v21, %v3672_v62 }
 0x1dd   :  { %2488 = vmatprep.subr.bf16.mxu0 %v3410_v31 }
 0x1e0   :  { %2489 = vmatpush1.bf16.msra.mxu0 %v3408_v32 }
 0x1e1   :  { %2490 = vmatprep.subr.bf16.mxu0 %v3413_v17 }
 0x1e4   :  { %2491 = vmatpush1.bf16.msra.mxu0 %v3411_v22  ;;  %v2550_v22 = vrot.slane %v2541_v21, %v3680_v0  ;;  %v2921_v0 = vld [vmem:[#allocation2] ss:$0 sm:$0xff] }
 0x1e5   :  { %2492 = vmatprep.subr.bf16.mxu0 %v3416_v23 }
 0x1e8   :  { %2493 = vmatpush1.bf16.msra.mxu0 %v3414_v26 }
 0x1e9   :  { %2494 = vmatprep.subr.bf16.mxu0 %v3419_v33 }
 0x1ec   :  { %2495 = vmatpush1.bf16.msra.mxu0 %v3417_v34 }
 0x1ed   :  { %2496 = vmatprep.subr.bf16.mxu0 %v3422_v10 }
 0x1f0   :  { %2497 = vmatpush1.bf16.msra.mxu0 %v3420_v35 }
 0x1f1   :  { %2498 = vmatprep.subr.bf16.mxu0 %v3425_v36 }
 0x1f4   :  { %2499 = vmatpush1.bf16.msra.mxu0 %v3423_v39 }
 0x1f5   :  { %2500 = vmatprep.subr.bf16.mxu0 %v3428_v37 }
 0x1f8   :  { %2501 = vmatpush1.bf16.msra.mxu0 %v3426_v56 }
 0x1f9   :  { %2502 = vmatprep.subr.bf16.mxu0 %v3431_v38 }
 0x1fc   :  { %2503 = vmatpush1.bf16.msra.mxu0 %v3429_v40 }
 0x1fd   :  { %2504 = vmatprep.subr.bf16.mxu0 %v3434_v41 }
 0x200   :  { %2505 = vmatpush1.bf16.msra.mxu0 %v3432_v42 }
 0x201   :  { %2506 = vmatprep.subr.bf16.mxu0 %v3437_v43 }
 0x204   :  { %2507 = vmatpush1.bf16.msra.mxu0 %v3435_v44 }
 0x205   :  { %2508 = vmatprep.subr.bf16.mxu0 %v3440_v45 }
 0x208   :  { %2509 = vmatpush1.bf16.msra.mxu0 %v3438_v46 }
 0x209   :  { %2510 = vmatprep.subr.bf16.mxu0 %v3443_v47 }
 0x20c   :  { %2511 = vmatpush1.bf16.msra.mxu0 %v3441_v48 }
 0x20d   :  { %2512 = vmatprep.subr.bf16.mxu0 %v3446_v49 }
 0x210   :  { %2513 = vmatpush1.bf16.msra.mxu0 %v3444_v50 }
 0x211   :  { %2514 = vmatprep.subr.bf16.mxu0 %v3449_v51 }
 0x214   :  { %2515 = vmatpush1.bf16.msra.mxu0 %v3447_v52 }
 0x215   :  { %2516 = vmatprep.subr.bf16.mxu0 %v3452_v53 }
 0x218   :  { %2517 = vmatpush1.bf16.msra.mxu0 %v3450_v54 }
 0x24e   :  { %v2010_v60 = vpop.f32.mrb[4].mxu1 }
 0x24f   :  { %v2932_v1 = vadd.f32 %v2010_v60, %v346_v58  ;;  %v2012_v27 = vpop.f32.mrb[5].mxu1 }
 0x250   :  { %v2933_v2 = vadd.f32 %v2012_v27, %v350_v59  ;;  %v2014_v3 = vpop.f32.mrb[6].mxu1 }
 0x251   :  { %v2029_v4 = vmul.f32 0.2, %v2932_v1  ;;  %v2934_v5 = vadd.f32 %v2014_v3, %v346_v58  ;;  %v2016_v6 = vpop.f32.mrb[7].mxu1  ;;  %vm2021_vm4 = vcmp.gt.f32.partialorder %v2932_v1, 0.0 }
 0x252   :  { %v2030_v7 = vmul.f32 0.2, %v2933_v2  ;;  %v2935_v8 = vadd.f32 %v2016_v6, %v350_v59  ;;  %vm2022_vm5 = vcmp.gt.f32.partialorder %v2933_v2, 0.0 }
 0x253   :  { %vm2025_vm6 = vcmp.gt.f32.partialorder %v2934_v5, 0.0  ;;  %v2033_v11 = vmul.f32 0.2, %v2934_v5  ;;  %v2037_v12 = vsel %vm2021_vm4, %v2932_v1, %v2029_v4 }
 0x254   :  { %vm2026_vm7 = vcmp.gt.f32.partialorder %v2935_v8, 0.0  ;;  %v2034_v61 = vmul.f32 0.2, %v2935_v8  ;;  %v2038_v63 = vsel %vm2022_vm5, %v2933_v2, %v2030_v7 }
 0x255   :  { %v2041_v13 = vsel %vm2025_vm6, %v2934_v5, %v2033_v11 }
 0x256   :  { %v2045_v14 = vpack.c.bf16 %v2041_v13, %v2037_v12  ;;  %v2042_v15 = vsel %vm2026_vm7, %v2935_v8, %v2034_v61 }
 0x257   :  { %v2046_v16 = vpack.c.bf16 %v2042_v15, %v2038_v63 }
 0x259   :  { %2518 = vmatprep.mubr.bf16.mxu0 %v2046_v16 }
 0x25a   :  { %2519 = vmatmul.mubr.bf16.vlgmr.msra.gmra.mrb[4].mxu0 %v2045_v14 }
 0x32d   :  { %v2520_v24 = vpop.f32.mrb[4].mxu0 }
 0x32e   :  { %v2936_v25 = vadd.f32 %v2520_v24, %v2116_v19  ;;  %v2522_v28 = vpop.f32.mrb[5].mxu0 }
 0x32f   :  { %v2937_v29 = vadd.f32 %v2522_v28, %v2120_v20  ;;  %v2524_v30 = vpop.f32.mrb[6].mxu0 }
 0x330   :  { %vm2529_vm8 = vcmp.gt.f32.partialorder %v2936_v25, 0.0  ;;  %v2533_v31 = vmul.f32 0.2, %v2936_v25  ;;  %v2938_v32 = vadd.f32 %v2524_v30, %v2116_v19  ;;  %v2526_v17 = vpop.f32.mrb[7].mxu0 }
 0x331   :  { %vm2530_vm9 = vcmp.gt.f32.partialorder %v2937_v29, 0.0  ;;  %v2534_v23 = vmul.f32 0.2, %v2937_v29  ;;  %v2939_v26 = vadd.f32 %v2526_v17, %v2120_v20 }
 0x332   :  { %vm2531_vm10 = vcmp.gt.f32.partialorder %v2938_v32, 0.0  ;;  %v2535_v33 = vmul.f32 0.2, %v2938_v32  ;;  %v2537_v34 = vsel %vm2529_vm8, %v2936_v25, %v2533_v31 }
 0x333   :  { %vm2532_vm11 = vcmp.gt.f32.partialorder %v2939_v26, 0.0  ;;  %v2536_v10 = vmul.f32 0.2, %v2939_v26  ;;  %v2538_v35 = vsel %vm2530_vm9, %v2937_v29, %v2534_v23  ;;  %v2553_v36 = vmul.f32 %v2546_v9, %v2537_v34 }
 0x334   :  { %v2554_v39 = vmul.f32 %v2550_v22, %v2538_v35  ;;  %v2539_v37 = vsel %vm2531_vm10, %v2938_v32, %v2535_v33 }
 0x335   :  { %v2540_v56 = vsel %vm2532_vm11, %v2939_v26, %v2536_v10  ;;  %v2555_v62 = vmul.f32 %v2546_v9, %v2539_v37 }
 0x336   :  { %v2557_v38 = vadd.f32 %v2554_v39, %v2553_v36  ;;  %v2556_v40 = vmul.f32 %v2550_v22, %v2540_v56 }
 0x338   :  { %2558 = vadd.xlane.f32.xlu0 %v2557_v38  ;;  %v2560_v41 = vadd.f32 %v2556_v40, %v2555_v62 }
 0x33c   :  { %2561 = vadd.xlane.f32.xlu0 %v2560_v41 }
 0x3c5   :  { %v2559_v42 = vpop.xlane.xlu0 %2558 }
 0x3c6   :  { %v2570_v43 = vadd.f32 %v2921_v0, %v2559_v42 }
 0x3c8   :  { %v2922_v44 = vmul.f32 -1.442695, %v2570_v43 }
 0x3c9   :  { %v2562_v45 = vpop.xlane.xlu0 %2561 }
 0x3ca   :  { %3453 = vpow2.f32 %v2922_v44  ;;  %v2571_v46 = vadd.f32 %v2921_v0, %v2562_v45 }
 0x3cc   :  { %v2923_v47 = vmul.f32 -1.442695, %v2571_v46 }
 0x3ce   :  { %3455 = vpow2.f32 %v2923_v47 }
 0x3d4   :  { %v3454_v48 = vpop.eup %3453 }
 0x3d5   :  { %v2578_v49 = vadd.f32 1.0, %v3454_v48 }
 0x3d7   :  { %3457 = vrcp.f32 %v2578_v49 }
 0x3d8   :  { %v3456_v50 = vpop.eup %3455 }
 0x3d9   :  { %v2579_v51 = vadd.f32 1.0, %v3456_v50 }
 0x3db   :  { %3459 = vrcp.f32 %v2579_v51 }
 0x3e1   :  { %v3458_v52 = vpop.eup %3457 }
 0x3e2   :  { %2585 = vst.msk [vmem:[%s3716_s7] sm:$0xff] %vm2584_vm12, %v3458_v52 }
 0x3e5   :  { %v3460_v53 = vpop.eup %3459 }
 0x3e6   :  { %2586 = vst.msk [vmem:[%s3716_s7 + $0x8] sm:$0xff] %vm2584_vm12, %v3460_v53 }
 0x3e7   :  { %2591 = vsyncpa [#allocation4], 1 }
 0x3e8   :  { %2592 = vsyncpa [#allocation6], 1 }

</bundles_post_ra>
